<compile_context>
chip_gen: v5e
topology: v5e:2x2
jax: 0.10.0
libtpu: 0.0.40
codegen_flags: <defaults>
</compile_context>

<pallas_src>
import functools

import jax
import jax.numpy as jnp
from jax.experimental import pallas as pl
from jax.experimental.pallas import tpu as pltpu

LANE = 128
HALO = 16   # halo rows appended to every time tile (multiple of 16 >= K-1)


def _round_up(n, m):
    return (n + m - 1) // m * m


def _vmem_limit_bytes():
    # Generation-dependent VMEM cap: ~3/4 of physical (96 MiB v5e/v6e, 48 MiB v7x).
    try:
        cap = pltpu.get_tpu_info().vmem_capacity_bytes
        return int(min(cap, 128 * 1024 * 1024) * 3 // 4)
    except Exception:
        return 48 * 1024 * 1024


# ----------------------------- kernels ---------------------------------------


def _conv_core(x_main_ref, x_tail_ref, shift_ref, w_ref, b_ref, *, K, tT, T, s_in):
    """(prev block's BN affine) + Conv1d(k=K, 'same') + bias for one time tile.

    x_main_ref : (1, tT, Cin)  bf16  buffer rows [j*tT, j*tT+tT)
    x_tail_ref : (1, HALO, Cin) bf16 buffer rows [j*tT+tT, j*tT+tT+HALO)  (halo)
    shift_ref  : (1, Cin) f32   BN shift / BN scale (zeros for the first block)
    w_ref      : (K*Cin, Cout) bf16  taps folded into contraction dim, BN scale pre-folded
    b_ref      : (1, Cout) f32
    Data rows of the input buffer live at [s_in, s_in+T); everything else (padding rows,
    uninitialized halo rows) is forced to zero in-register so the conv sees exact 'same'
    zero padding and the fused shift never leaks into boundary taps.
    """
    base = pl.program_id(0) * tT
    win = jnp.concatenate([x_main_ref[0], x_tail_ref[0]], axis=0).astype(jnp.float32)
    win = win + shift_ref[...]
    rows = jax.lax.broadcasted_iota(jnp.int32, (tT + HALO, 1), 0) + base
    valid = (rows >= s_in) & (rows < s_in + T)
    win = jnp.where(valid, win, 0.0).astype(jnp.bfloat16)

    # im2col: one MXU matmul with a K*Cin-deep contraction (fp32 accumulation).
    # TODO(synk): on v7x the MRB makes K accumulating per-tap matmuls cheaper than this
    # lane-concat; kept im2col (better on v5e/v6e MRF) for a single code path.
    xi = jnp.concatenate([win[k:k + tT, :] for k in range(K)], axis=-1)
    acc = jnp.dot(xi, w_ref[...], preferred_element_type=jnp.float32)
    return acc + b_ref[...]


def _conv_tanh_stats_kernel(xm_ref, xt_ref, shift_ref, w_ref, b_ref,
                            y_ref, stats_ref, *, K, tT, T, s_in, s_out):
    """Blocks 0..3: conv + bias -> tanh; emit the bf16 activation tile plus fp32
    per-channel partial (sum, sum-of-squares) over this tile's valid rows so the wrapper
    can form GLOBAL BatchNorm statistics over the true (B, T)."""
    acc = _conv_core(xm_ref, xt_ref, shift_ref, w_ref, b_ref, K=K, tT=tT, T=T, s_in=s_in)
    y = jnp.tanh(acc)                                   # fp32 (EUP)
    y_ref[0] = y.astype(y_ref.dtype)

    rows = jax.lax.broadcasted_iota(jnp.int32, (tT, 1), 0) + pl.program_id(0) * tT
    ym = jnp.where((rows >= s_out) & (rows < s_out + T), y, 0.0)
    s = jnp.sum(ym, axis=0, keepdims=True)              # (1, Cout)
    ss = jnp.sum(ym * ym, axis=0, keepdims=True)        # (1, Cout)
    stats_ref[0, 0, :, :] = jnp.concatenate([s, ss], axis=0)


def _conv_final_kernel(xm_ref, xt_ref, shift_ref, w_ref, b_ref, o_ref, *, K, tT, T, s_in):
    """Last block: (previous BN affine) + conv + bias only; fp32 lane-dense output."""
    o_ref[0] = _conv_core(xm_ref, xt_ref, shift_ref, w_ref, b_ref,
                          K=K, tT=tT, T=T, s_in=s_in).astype(o_ref.dtype)


# ----------------------------- pallas_call wrapper -----------------------------


def _conv_block(x, shift_n, w2d, bias, *, T, tT, nT, s_in, s_out, with_tanh_stats):
    B, R, cin_p = x.shape
    KC, cout_p = w2d.shape
    K = KC // cin_p
    t_blocks = tT // HALO   # tail block index is in units of HALO rows

    in_specs = [
        pl.BlockSpec((1, tT, cin_p), lambda j, b: (b, j, 0)),                      # tile
        pl.BlockSpec((1, HALO, cin_p), lambda j, b: (b, (j + 1) * t_blocks, 0)),   # halo tail
        pl.BlockSpec((1, cin_p), lambda j, b: (0, 0)),                             # BN shift/scale
        pl.BlockSpec((KC, cout_p), lambda j, b: (0, 0)),                           # folded weights
        pl.BlockSpec((1, cout_p), lambda j, b: (0, 0)),                            # bias
    ]
    compiler_params = pltpu.CompilerParams(
        dimension_semantics=("parallel", "parallel"),   # time tiles lead -> v7x 2-core split
        vmem_limit_bytes=_vmem_limit_bytes(),
    )

    if with_tanh_stats:
        kern = functools.partial(_conv_tanh_stats_kernel, K=K, tT=tT, T=T,
                                 s_in=s_in, s_out=s_out)
        out_shape = (
            jax.ShapeDtypeStruct((B, R, cout_p), jnp.bfloat16),
            jax.ShapeDtypeStruct((B, nT, 2, cout_p), jnp.float32),
        )
        out_specs = (
            pl.BlockSpec((1, tT, cout_p), lambda j, b: (b, j, 0)),
            pl.BlockSpec((1, 1, 2, cout_p), lambda j, b: (b, j, 0, 0)),
        )
    else:
        kern = functools.partial(_conv_final_kernel, K=K, tT=tT, T=T, s_in=s_in)
        out_shape = jax.ShapeDtypeStruct((B, R, cout_p), jnp.float32)
        out_specs = pl.BlockSpec((1, tT, cout_p), lambda j, b: (b, j, 0))

    return pl.pallas_call(
        kern,
        out_shape=out_shape,
        grid=(nT, B),
        in_specs=in_specs,
        out_specs=out_specs,
        compiler_params=compiler_params,
    )(x, x, shift_n, w2d, bias)


def _prep_block_params(w, b, gamma, beta, scale):
    """Pad channel dims to lane multiples, fold the previous block's BN scale into the
    weights (over the input-channel axis), and fold the K taps into the contraction dim.
    Padded gamma entries are 0 so padded channels stay exactly 0 downstream."""
    K, cin, cout = w.shape
    cin_p, cout_p = _round_up(cin, LANE), _round_up(cout, LANE)
    w_p = jnp.zeros((K, cin_p, cout_p), jnp.float32).at[:, :cin, :cout].set(w)
    w_p = w_p * scale[None, :, None]
    w2d = w_p.reshape(K * cin_p, cout_p).astype(jnp.bfloat16)
    b_p = jnp.zeros((1, cout_p), jnp.float32).at[0, :cout].set(b)
    g_p = jnp.zeros((cout_p,), jnp.float32).at[:cout].set(gamma)
    be_p = jnp.zeros((cout_p,), jnp.float32).at[:cout].set(beta)
    return w2d, b_p, g_p, be_p


def decoder_postnet(x, params, *, tile_t=512):
    """x: (B, T, mel) -> (B, T, mel); matches DecoderPostnet.forward (training-mode BN).

    # TODO(synk): nn.BatchNorm1d running_mean/running_var buffer updates are training
    # bookkeeping only and are not modeled; the forward output uses batch statistics,
    # exactly as the freshly built PyTorch module does in training mode.
    """
    B, T, mel = x.shape
    n_blocks = len(params)
    K = params[0][0].shape[0]
    front = (K - 1) // 2
    assert front <= HALO - front, "kernel_size too large for HALO"

    # Staggered data-row offsets: block i's input buffer stores data row t at row t+s[i],
    # decreasing by `front` per block. Every block's *aligned* output tile is then read
    # directly by the next block (no per-block halo rebuild / extra HBM copies), while the
    # per-tile window [j*tT, j*tT+tT+HALO) always covers the K-tap neighbourhood.
    s = [front * (n_blocks - i) for i in range(n_blocks + 1)]

    # Tile rows hug T + max offset so padded rows (wasted conv/tanh/stat work) are minimal.
    need = T + s[1]
    nT = pl.cdiv(need, max(tile_t, HALO))
    tT = _round_up(pl.cdiv(need, nT), HALO)
    T_pad = nT * tT
    R = T_pad + HALO                      # every activation buffer carries a HALO-row tail

    # Initial activation: bf16, channels padded to a lane multiple, data at [s[0], s[0]+T).
    cin_p = _round_up(mel, LANE)
    h = jnp.zeros((B, R, cin_p), jnp.bfloat16)
    h = h.at[:, s[0]:s[0] + T, :mel].set(x.astype(jnp.bfloat16))

    scale = jnp.ones((cin_p,), jnp.float32)       # prev-block BN scale (folded into weights)
    shift_n = jnp.zeros((1, cin_p), jnp.float32)  # prev-block BN shift / scale (added in-kernel)

    out = None
    for i, (w, b, gamma, beta) in enumerate(params):
        w2d, b_p, g_p, be_p = _prep_block_params(w, b, gamma, beta, scale)
        if i < n_blocks - 1:
            y, stats = _conv_block(h, shift_n, w2d, b_p, T=T, tT=tT, nT=nT,
                                   s_in=s[i], s_out=s[i + 1], with_tanh_stats=True)
            # Global training-mode BN statistics over the true (B, T) rows (fp32,
            # single-pass sum / sum-of-squares reduced over all tiles and batch).
            cnt = float(B * T)
            mean = jnp.sum(stats[:, :, 0, :], axis=(0, 1)) / cnt
            var = jnp.maximum(jnp.sum(stats[:, :, 1, :], axis=(0, 1)) / cnt - mean * mean, 0.0)
            inv_std = jax.lax.rsqrt(var + 1e-5)
            scale = g_p * inv_std                 # folded into the NEXT block's conv weights
            shift = be_p - mean * scale
            # shift/scale is exact for gamma != 0 (BN default); padded channels are 0/0 -> 0.
            shift_n = jnp.where(scale != 0,
                                shift / jnp.where(scale != 0, scale, 1.0), 0.0)[None, :]
            h = y                                 # bf16, un-normalized (normalized on read)
        else:
            out = _conv_block(h, shift_n, w2d, b_p, T=T, tT=tT, nT=nT,
                              s_in=s[i], s_out=s[i + 1], with_tanh_stats=False)

    return out[:, s[n_blocks]:s[n_blocks] + T, :mel]


# ---------------- deterministic parameter construction ------------------------


def _xavier_uniform(key, K, cin, cout, gain):
    fan_in, fan_out = cin * K, cout * K
    bound = gain * (6.0 / (fan_in + fan_out)) ** 0.5
    # stored as (K, Cin, Cout) for the channels-last kernels
    return jax.random.uniform(key, (K, cin, cout), jnp.float32, -bound, bound)


def init_params(key, mel_size, hidden_size, kernel_size):
    tanh_gain = 5.0 / 3.0  # nn.init.calculate_gain('tanh')
    dims = [(mel_size, hidden_size)] + [(hidden_size, hidden_size)] * 3 \
           + [(hidden_size, mel_size)]
    gains = [tanh_gain] * 4 + [1.0]  # last conv uses w_init='linear'
    params = []
    for (cin, cout), gain in zip(dims, gains):
        key, kw, kb = jax.random.split(key, 3)
        w = _xavier_uniform(kw, kernel_size, cin, cout, gain)
        bb = 1.0 / (cin * kernel_size) ** 0.5  # PyTorch default conv bias init
        b = jax.random.uniform(kb, (cout,), jnp.float32, -bb, bb)
        gamma = jnp.ones((cout,), jnp.float32)   # BatchNorm1d default weight
        beta = jnp.zeros((cout,), jnp.float32)   # BatchNorm1d default bias
        params.append((w, b, gamma, beta))
    return params


if __name__ == "__main__":
    key = jax.random.PRNGKey(0)
    mel_size, hidden_size, kernel_size = 16, 32, 5  # small demo shapes
    B, T = 2, 8

    pkey, xkey = jax.random.split(key)
    params = init_params(pkey, mel_size, hidden_size, kernel_size)
    x = jax.random.normal(xkey, (B, T, mel_size), jnp.float32)

    out = jax.jit(decoder_postnet)(x, params)
    jax.block_until_ready(out)
    assert out.shape == (B, T, mel_size)
    assert bool(jnp.all(jnp.isfinite(out)))
    print("KERNEL_OK")
</pallas_src>

<mosaic_0001>
module attributes {stable_mosaic.version = 11 : i64} {
  func.func @_conv_tanh_stats_kernel(%arg0: i32, %arg1: i32, %arg2: memref<1x16x128xbf16, #tpu.memory_space<vmem>>, %arg3: memref<1x16x128xbf16, #tpu.memory_space<vmem>>, %arg4: memref<1x128xf32, #tpu.memory_space<vmem>>, %arg5: memref<640x128xbf16, #tpu.memory_space<vmem>>, %arg6: memref<1x128xf32, #tpu.memory_space<vmem>>, %arg7: memref<1x16x128xbf16, #tpu.memory_space<vmem>>, %arg8: memref<1x1x2x128xf32, #tpu.memory_space<vmem>>) attributes {dimension_semantics = [#tpu.dimension_semantics<parallel>, #tpu.dimension_semantics<parallel>], iteration_bounds = array<i64: 1, 2>, scalar_prefetch = 0 : i64, scratch_operands = 0 : i64, tpu.core_type = #tpu.core_type<tc>, window_params = [{transform_indices = @transform_0, window_bounds = array<i64: 1, 16, 128>}, {transform_indices = @transform_1, window_bounds = array<i64: 1, 16, 128>}, {pipeline_mode = #tpu.pipeline_mode<synchronous>, transform_indices = @transform_2, window_bounds = array<i64: 1, 128>}, {pipeline_mode = #tpu.pipeline_mode<synchronous>, transform_indices = @transform_3, window_bounds = array<i64: 640, 128>}, {pipeline_mode = #tpu.pipeline_mode<synchronous>, transform_indices = @transform_4, window_bounds = array<i64: 1, 128>}, {transform_indices = @transform_5, window_bounds = array<i64: 1, 16, 128>}, {transform_indices = @transform_6, window_bounds = array<i64: 1, 1, 2, 128>}]} {
    %c16_i32 = arith.constant 16 : i32
    %0 = arith.muli %arg0, %c16_i32 : i32
    %c0 = arith.constant 0 : index
    %c0_0 = arith.constant 0 : index
    %c0_1 = arith.constant 0 : index
    %1 = vector.load %arg2[%c0, %c0_0, %c0_1] : memref<1x16x128xbf16, #tpu.memory_space<vmem>>, vector<1x16x128xbf16>
    %2 = vector.shape_cast %1 : vector<1x16x128xbf16> to vector<16x128xbf16>
    %c0_2 = arith.constant 0 : index
    %c0_3 = arith.constant 0 : index
    %c0_4 = arith.constant 0 : index
    %3 = vector.load %arg3[%c0_2, %c0_3, %c0_4] : memref<1x16x128xbf16, #tpu.memory_space<vmem>>, vector<1x16x128xbf16>
    %4 = vector.shape_cast %3 : vector<1x16x128xbf16> to vector<16x128xbf16>
    %5 = tpu.concatenate %2, %4 in 0 : vector<16x128xbf16>, vector<16x128xbf16> -> vector<32x128xbf16>
    %6 = arith.extf %5 : vector<32x128xbf16> to vector<32x128xf32>
    %c0_5 = arith.constant 0 : index
    %c0_6 = arith.constant 0 : index
    %7 = vector.load %arg4[%c0_5, %c0_6] : memref<1x128xf32, #tpu.memory_space<vmem>>, vector<1x128xf32>
    %8 = vector.broadcast %7 : vector<1x128xf32> to vector<32x128xf32>
    %9 = arith.addf %6, %8 : vector<32x128xf32>
    %10 = tpu.iota {dimensions = array<i32: 0>} : vector<32x1xi32>
    %11 = vector.broadcast %0 : i32 to vector<32x1xi32>
    %12 = arith.addi %10, %11 : vector<32x1xi32>
    %c10_i32 = arith.constant 10 : i32
    %13 = vector.broadcast %c10_i32 : i32 to vector<32x1xi32>
    %14 = arith.cmpi sge, %12, %13 : vector<32x1xi32>
    %c18_i32 = arith.constant 18 : i32
    %15 = vector.broadcast %c18_i32 : i32 to vector<32x1xi32>
    %16 = arith.cmpi slt, %12, %15 : vector<32x1xi32>
    %17 = arith.andi %14, %16 : vector<32x1xi1>
    %cst = arith.constant 0.000000e+00 : f32
    %18 = vector.shape_cast %17 : vector<32x1xi1> to vector<32x1xi1>
    %19 = vector.broadcast %18 : vector<32x1xi1> to vector<32x128xi1>
    %20 = vector.broadcast %cst : f32 to vector<32x128xf32>
    %21 = arith.select %19, %9, %20 : vector<32x128xi1>, vector<32x128xf32>
    %22 = arith.truncf %21 : vector<32x128xf32> to vector<32x128xbf16>
    %23 = vector.extract_strided_slice %22 {offsets = [0, 0], sizes = [16, 128], strides = [1, 1]} : vector<32x128xbf16> to vector<16x128xbf16>
    %24 = vector.extract_strided_slice %22 {offsets = [1, 0], sizes = [16, 128], strides = [1, 1]} : vector<32x128xbf16> to vector<16x128xbf16>
    %25 = vector.extract_strided_slice %22 {offsets = [2, 0], sizes = [16, 128], strides = [1, 1]} : vector<32x128xbf16> to vector<16x128xbf16>
    %26 = vector.extract_strided_slice %22 {offsets = [3, 0], sizes = [16, 128], strides = [1, 1]} : vector<32x128xbf16> to vector<16x128xbf16>
    %27 = vector.extract_strided_slice %22 {offsets = [4, 0], sizes = [16, 128], strides = [1, 1]} : vector<32x128xbf16> to vector<16x128xbf16>
    %28 = tpu.concatenate %23, %24, %25, %26, %27 in 1 : vector<16x128xbf16>, vector<16x128xbf16>, vector<16x128xbf16>, vector<16x128xbf16>, vector<16x128xbf16> -> vector<16x640xbf16>
    %c0_7 = arith.constant 0 : index
    %c0_8 = arith.constant 0 : index
    %29 = vector.load %arg5[%c0_7, %c0_8] : memref<640x128xbf16, #tpu.memory_space<vmem>>, vector<640x128xbf16>
    %cst_9 = arith.constant dense<0.000000e+00> : vector<16x128xf32>
    %30 = tpu.matmul %28, %29, %cst_9 {dimension_numbers = #tpu.dot_dimension_numbers<[1], [0], [0], [1], [0, 0, 1, 1], [], []>} : vector<16x640xbf16>, vector<640x128xbf16>, vector<16x128xf32> -> vector<16x128xf32>
    %c0_10 = arith.constant 0 : index
    %c0_11 = arith.constant 0 : index
    %31 = vector.load %arg6[%c0_10, %c0_11] : memref<1x128xf32, #tpu.memory_space<vmem>>, vector<1x128xf32>
    %32 = vector.broadcast %31 : vector<1x128xf32> to vector<16x128xf32>
    %33 = arith.addf %30, %32 : vector<16x128xf32>
    %34 = math.tanh %33 : vector<16x128xf32>
    %35 = arith.truncf %34 : vector<16x128xf32> to vector<16x128xbf16>
    %c0_12 = arith.constant 0 : index
    %c0_13 = arith.constant 0 : index
    %c0_14 = arith.constant 0 : index
    %36 = vector.load %arg7[%c0_12, %c0_13, %c0_14] : memref<1x16x128xbf16, #tpu.memory_space<vmem>>, vector<1x16x128xbf16>
    %37 = vector.shape_cast %36 : vector<1x16x128xbf16> to vector<16x128xbf16>
    %38 = vector.shape_cast %35 : vector<16x128xbf16> to vector<1x16x128xbf16>
    tpu.vector_store %arg7[%c0_12, %c0_13, %c0_14], %38 {strides = array<i32>} : memref<1x16x128xbf16, #tpu.memory_space<vmem>>, vector<1x16x128xbf16>,
    %39 = tpu.iota {dimensions = array<i32: 0>} : vector<16x1xi32>
    %c16_i32_15 = arith.constant 16 : i32
    %40 = arith.muli %arg0, %c16_i32_15 : i32
    %41 = vector.broadcast %40 : i32 to vector<16x1xi32>
    %42 = arith.addi %39, %41 : vector<16x1xi32>
    %c8_i32 = arith.constant 8 : i32
    %43 = vector.broadcast %c8_i32 : i32 to vector<16x1xi32>
    %44 = arith.cmpi sge, %42, %43 : vector<16x1xi32>
    %c16_i32_16 = arith.constant 16 : i32
    %45 = vector.broadcast %c16_i32_16 : i32 to vector<16x1xi32>
    %46 = arith.cmpi slt, %42, %45 : vector<16x1xi32>
    %47 = arith.andi %44, %46 : vector<16x1xi1>
    %cst_17 = arith.constant 0.000000e+00 : f32
    %48 = vector.shape_cast %47 : vector<16x1xi1> to vector<16x1xi1>
    %49 = vector.broadcast %48 : vector<16x1xi1> to vector<16x128xi1>
    %50 = vector.broadcast %cst_17 : f32 to vector<16x128xf32>
    %51 = arith.select %49, %34, %50 : vector<16x128xi1>, vector<16x128xf32>
    %cst_18 = arith.constant dense<0.000000e+00> : vector<128xf32>
    %52 = vector.multi_reduction <add>, %51, %cst_18 [0] : vector<16x128xf32> to vector<128xf32>
    %53 = vector.shape_cast %52 : vector<128xf32> to vector<1x128xf32>
    %54 = arith.mulf %51, %51 : vector<16x128xf32>
    %cst_19 = arith.constant dense<0.000000e+00> : vector<128xf32>
    %55 = vector.multi_reduction <add>, %54, %cst_19 [0] : vector<16x128xf32> to vector<128xf32>
    %56 = vector.shape_cast %55 : vector<128xf32> to vector<1x128xf32>
    %57 = tpu.concatenate %53, %56 in 0 : vector<1x128xf32>, vector<1x128xf32> -> vector<2x128xf32>
    %c0_20 = arith.constant 0 : index
    %c0_21 = arith.constant 0 : index
    %c0_22 = arith.constant 0 : index
    %c0_23 = arith.constant 0 : index
    %58 = vector.load %arg8[%c0_20, %c0_21, %c0_22, %c0_23] : memref<1x1x2x128xf32, #tpu.memory_space<vmem>>, vector<1x1x2x128xf32>
    %59 = vector.shape_cast %58 : vector<1x1x2x128xf32> to vector<2x128xf32>
    %60 = vector.shape_cast %57 : vector<2x128xf32> to vector<1x1x2x128xf32>
    tpu.vector_store %arg8[%c0_20, %c0_21, %c0_22, %c0_23], %60 {strides = array<i32>} : memref<1x1x2x128xf32, #tpu.memory_space<vmem>>, vector<1x1x2x128xf32>,
    return
  }
  func.func @transform_0(%arg0: i32, %arg1: i32) -> (i32, i32, i32) {
    %c0_i32 = arith.constant 0 : i32
    %c0_i32_0 = arith.constant 0 : i32
    return %arg1, %arg0, %c0_i32 : i32, i32, i32
  }
  func.func @transform_1(%arg0: i32, %arg1: i32) -> (i32, i32, i32) {
    %c1_i32 = arith.constant 1 : i32
    %0 = arith.addi %arg0, %c1_i32 : i32
    %c1_i32_0 = arith.constant 1 : i32
    %1 = arith.muli %0, %c1_i32_0 : i32
    %c0_i32 = arith.constant 0 : i32
    %c0_i32_1 = arith.constant 0 : i32
    return %arg1, %1, %c0_i32 : i32, i32, i32
  }
  func.func @transform_2(%arg0: i32, %arg1: i32) -> (i32, i32) {
    %c0_i32 = arith.constant 0 : i32
    %c0_i32_0 = arith.constant 0 : i32
    %c0_i32_1 = arith.constant 0 : i32
    return %c0_i32, %c0_i32_0 : i32, i32
  }
  func.func @transform_3(%arg0: i32, %arg1: i32) -> (i32, i32) {
    %c0_i32 = arith.constant 0 : i32
    %c0_i32_0 = arith.constant 0 : i32
    %c0_i32_1 = arith.constant 0 : i32
    return %c0_i32, %c0_i32_0 : i32, i32
  }
  func.func @transform_4(%arg0: i32, %arg1: i32) -> (i32, i32) {
    %c0_i32 = arith.constant 0 : i32
    %c0_i32_0 = arith.constant 0 : i32
    %c0_i32_1 = arith.constant 0 : i32
    return %c0_i32, %c0_i32_0 : i32, i32
  }
  func.func @transform_5(%arg0: i32, %arg1: i32) -> (i32, i32, i32) {
    %c0_i32 = arith.constant 0 : i32
    %c0_i32_0 = arith.constant 0 : i32
    return %arg1, %arg0, %c0_i32 : i32, i32, i32
  }
  func.func @transform_6(%arg0: i32, %arg1: i32) -> (i32, i32, i32, i32) {
    %c0_i32 = arith.constant 0 : i32
    %c0_i32_0 = arith.constant 0 : i32
    %c0_i32_1 = arith.constant 0 : i32
    return %arg1, %arg0, %c0_i32, %c0_i32_0 : i32, i32, i32, i32
  }
}

module attributes {stable_mosaic.version = 11 : i64} {
  func.func @_conv_tanh_stats_kernel(%arg0: i32, %arg1: i32, %arg2: memref<1x16x128xbf16, #tpu.memory_space<vmem>>, %arg3: memref<1x16x128xbf16, #tpu.memory_space<vmem>>, %arg4: memref<1x128xf32, #tpu.memory_space<vmem>>, %arg5: memref<640x128xbf16, #tpu.memory_space<vmem>>, %arg6: memref<1x128xf32, #tpu.memory_space<vmem>>, %arg7: memref<1x16x128xbf16, #tpu.memory_space<vmem>>, %arg8: memref<1x1x2x128xf32, #tpu.memory_space<vmem>>) attributes {dimension_semantics = [#tpu.dimension_semantics<parallel>, #tpu.dimension_semantics<parallel>], iteration_bounds = array<i64: 1, 2>, scalar_prefetch = 0 : i64, scratch_operands = 0 : i64, tpu.core_type = #tpu.core_type<tc>, window_params = [{transform_indices = @transform_0, window_bounds = array<i64: 1, 16, 128>}, {transform_indices = @transform_1, window_bounds = array<i64: 1, 16, 128>}, {pipeline_mode = #tpu.pipeline_mode<synchronous>, transform_indices = @transform_2, window_bounds = array<i64: 1, 128>}, {pipeline_mode = #tpu.pipeline_mode<synchronous>, transform_indices = @transform_3, window_bounds = array<i64: 640, 128>}, {pipeline_mode = #tpu.pipeline_mode<synchronous>, transform_indices = @transform_4, window_bounds = array<i64: 1, 128>}, {transform_indices = @transform_5, window_bounds = array<i64: 1, 16, 128>}, {transform_indices = @transform_6, window_bounds = array<i64: 1, 1, 2, 128>}]} {
    %c16_i32 = arith.constant 16 : i32
    %0 = arith.muli %arg0, %c16_i32 : i32
    %c0 = arith.constant 0 : index
    %c0_0 = arith.constant 0 : index
    %c0_1 = arith.constant 0 : index
    %1 = vector.load %arg2[%c0, %c0_0, %c0_1] : memref<1x16x128xbf16, #tpu.memory_space<vmem>>, vector<1x16x128xbf16>
    %2 = vector.shape_cast %1 : vector<1x16x128xbf16> to vector<16x128xbf16>
    %c0_2 = arith.constant 0 : index
    %c0_3 = arith.constant 0 : index
    %c0_4 = arith.constant 0 : index
    %3 = vector.load %arg3[%c0_2, %c0_3, %c0_4] : memref<1x16x128xbf16, #tpu.memory_space<vmem>>, vector<1x16x128xbf16>
    %4 = vector.shape_cast %3 : vector<1x16x128xbf16> to vector<16x128xbf16>
    %5 = tpu.concatenate %2, %4 in 0 : vector<16x128xbf16>, vector<16x128xbf16> -> vector<32x128xbf16>
    %6 = arith.extf %5 : vector<32x128xbf16> to vector<32x128xf32>
    %c0_5 = arith.constant 0 : index
    %c0_6 = arith.constant 0 : index
    %7 = vector.load %arg4[%c0_5, %c0_6] : memref<1x128xf32, #tpu.memory_space<vmem>>, vector<1x128xf32>
    %8 = vector.broadcast %7 : vector<1x128xf32> to vector<32x128xf32>
    %9 = arith.addf %6, %8 : vector<32x128xf32>
    %10 = tpu.iota {dimensions = array<i32: 0>} : vector<32x1xi32>
    %11 = vector.broadcast %0 : i32 to vector<32x1xi32>
    %12 = arith.addi %10, %11 : vector<32x1xi32>
    %c8_i32 = arith.constant 8 : i32
    %13 = vector.broadcast %c8_i32 : i32 to vector<32x1xi32>
    %14 = arith.cmpi sge, %12, %13 : vector<32x1xi32>
    %c16_i32_7 = arith.constant 16 : i32
    %15 = vector.broadcast %c16_i32_7 : i32 to vector<32x1xi32>
    %16 = arith.cmpi slt, %12, %15 : vector<32x1xi32>
    %17 = arith.andi %14, %16 : vector<32x1xi1>
    %cst = arith.constant 0.000000e+00 : f32
    %18 = vector.shape_cast %17 : vector<32x1xi1> to vector<32x1xi1>
    %19 = vector.broadcast %18 : vector<32x1xi1> to vector<32x128xi1>
    %20 = vector.broadcast %cst : f32 to vector<32x128xf32>
    %21 = arith.select %19, %9, %20 : vector<32x128xi1>, vector<32x128xf32>
    %22 = arith.truncf %21 : vector<32x128xf32> to vector<32x128xbf16>
    %23 = vector.extract_strided_slice %22 {offsets = [0, 0], sizes = [16, 128], strides = [1, 1]} : vector<32x128xbf16> to vector<16x128xbf16>
    %24 = vector.extract_strided_slice %22 {offsets = [1, 0], sizes = [16, 128], strides = [1, 1]} : vector<32x128xbf16> to vector<16x128xbf16>
    %25 = vector.extract_strided_slice %22 {offsets = [2, 0], sizes = [16, 128], strides = [1, 1]} : vector<32x128xbf16> to vector<16x128xbf16>
    %26 = vector.extract_strided_slice %22 {offsets = [3, 0], sizes = [16, 128], strides = [1, 1]} : vector<32x128xbf16> to vector<16x128xbf16>
    %27 = vector.extract_strided_slice %22 {offsets = [4, 0], sizes = [16, 128], strides = [1, 1]} : vector<32x128xbf16> to vector<16x128xbf16>
    %28 = tpu.concatenate %23, %24, %25, %26, %27 in 1 : vector<16x128xbf16>, vector<16x128xbf16>, vector<16x128xbf16>, vector<16x128xbf16>, vector<16x128xbf16> -> vector<16x640xbf16>
    %c0_8 = arith.constant 0 : index
    %c0_9 = arith.constant 0 : index
    %29 = vector.load %arg5[%c0_8, %c0_9] : memref<640x128xbf16, #tpu.memory_space<vmem>>, vector<640x128xbf16>
    %cst_10 = arith.constant dense<0.000000e+00> : vector<16x128xf32>
    %30 = tpu.matmul %28, %29, %cst_10 {dimension_numbers = #tpu.dot_dimension_numbers<[1], [0], [0], [1], [0, 0, 1, 1], [], []>} : vector<16x640xbf16>, vector<640x128xbf16>, vector<16x128xf32> -> vector<16x128xf32>
    %c0_11 = arith.constant 0 : index
    %c0_12 = arith.constant 0 : index
    %31 = vector.load %arg6[%c0_11, %c0_12] : memref<1x128xf32, #tpu.memory_space<vmem>>, vector<1x128xf32>
    %32 = vector.broadcast %31 : vector<1x128xf32> to vector<16x128xf32>
    %33 = arith.addf %30, %32 : vector<16x128xf32>
    %34 = math.tanh %33 : vector<16x128xf32>
    %35 = arith.truncf %34 : vector<16x128xf32> to vector<16x128xbf16>
    %c0_13 = arith.constant 0 : index
    %c0_14 = arith.constant 0 : index
    %c0_15 = arith.constant 0 : index
    %36 = vector.load %arg7[%c0_13, %c0_14, %c0_15] : memref<1x16x128xbf16, #tpu.memory_space<vmem>>, vector<1x16x128xbf16>
    %37 = vector.shape_cast %36 : vector<1x16x128xbf16> to vector<16x128xbf16>
    %38 = vector.shape_cast %35 : vector<16x128xbf16> to vector<1x16x128xbf16>
    tpu.vector_store %arg7[%c0_13, %c0_14, %c0_15], %38 {strides = array<i32>} : memref<1x16x128xbf16, #tpu.memory_space<vmem>>, vector<1x16x128xbf16>,
    %39 = tpu.iota {dimensions = array<i32: 0>} : vector<16x1xi32>
    %c16_i32_16 = arith.constant 16 : i32
    %40 = arith.muli %arg0, %c16_i32_16 : i32
    %41 = vector.broadcast %40 : i32 to vector<16x1xi32>
    %42 = arith.addi %39, %41 : vector<16x1xi32>
    %c6_i32 = arith.constant 6 : i32
    %43 = vector.broadcast %c6_i32 : i32 to vector<16x1xi32>
    %44 = arith.cmpi sge, %42, %43 : vector<16x1xi32>
    %c14_i32 = arith.constant 14 : i32
    %45 = vector.broadcast %c14_i32 : i32 to vector<16x1xi32>
    %46 = arith.cmpi slt, %42, %45 : vector<16x1xi32>
    %47 = arith.andi %44, %46 : vector<16x1xi1>
    %cst_17 = arith.constant 0.000000e+00 : f32
    %48 = vector.shape_cast %47 : vector<16x1xi1> to vector<16x1xi1>
    %49 = vector.broadcast %48 : vector<16x1xi1> to vector<16x128xi1>
    %50 = vector.broadcast %cst_17 : f32 to vector<16x128xf32>
    %51 = arith.select %49, %34, %50 : vector<16x128xi1>, vector<16x128xf32>
    %cst_18 = arith.constant dense<0.000000e+00> : vector<128xf32>
    %52 = vector.multi_reduction <add>, %51, %cst_18 [0] : vector<16x128xf32> to vector<128xf32>
    %53 = vector.shape_cast %52 : vector<128xf32> to vector<1x128xf32>
    %54 = arith.mulf %51, %51 : vector<16x128xf32>
    %cst_19 = arith.constant dense<0.000000e+00> : vector<128xf32>
    %55 = vector.multi_reduction <add>, %54, %cst_19 [0] : vector<16x128xf32> to vector<128xf32>
    %56 = vector.shape_cast %55 : vector<128xf32> to vector<1x128xf32>
    %57 = tpu.concatenate %53, %56 in 0 : vector<1x128xf32>, vector<1x128xf32> -> vector<2x128xf32>
    %c0_20 = arith.constant 0 : index
    %c0_21 = arith.constant 0 : index
    %c0_22 = arith.constant 0 : index
    %c0_23 = arith.constant 0 : index
    %58 = vector.load %arg8[%c0_20, %c0_21, %c0_22, %c0_23] : memref<1x1x2x128xf32, #tpu.memory_space<vmem>>, vector<1x1x2x128xf32>
    %59 = vector.shape_cast %58 : vector<1x1x2x128xf32> to vector<2x128xf32>
    %60 = vector.shape_cast %57 : vector<2x128xf32> to vector<1x1x2x128xf32>
    tpu.vector_store %arg8[%c0_20, %c0_21, %c0_22, %c0_23], %60 {strides = array<i32>} : memref<1x1x2x128xf32, #tpu.memory_space<vmem>>, vector<1x1x2x128xf32>,
    return
  }
  func.func @transform_0(%arg0: i32, %arg1: i32) -> (i32, i32, i32) {
    %c0_i32 = arith.constant 0 : i32
    %c0_i32_0 = arith.constant 0 : i32
    return %arg1, %arg0, %c0_i32 : i32, i32, i32
  }
  func.func @transform_1(%arg0: i32, %arg1: i32) -> (i32, i32, i32) {
    %c1_i32 = arith.constant 1 : i32
    %0 = arith.addi %arg0, %c1_i32 : i32
    %c1_i32_0 = arith.constant 1 : i32
    %1 = arith.muli %0, %c1_i32_0 : i32
    %c0_i32 = arith.constant 0 : i32
    %c0_i32_1 = arith.constant 0 : i32
    return %arg1, %1, %c0_i32 : i32, i32, i32
  }
  func.func @transform_2(%arg0: i32, %arg1: i32) -> (i32, i32) {
    %c0_i32 = arith.constant 0 : i32
    %c0_i32_0 = arith.constant 0 : i32
    %c0_i32_1 = arith.constant 0 : i32
    return %c0_i32, %c0_i32_0 : i32, i32
  }
  func.func @transform_3(%arg0: i32, %arg1: i32) -> (i32, i32) {
    %c0_i32 = arith.constant 0 : i32
    %c0_i32_0 = arith.constant 0 : i32
    %c0_i32_1 = arith.constant 0 : i32
    return %c0_i32, %c0_i32_0 : i32, i32
  }
  func.func @transform_4(%arg0: i32, %arg1: i32) -> (i32, i32) {
    %c0_i32 = arith.constant 0 : i32
    %c0_i32_0 = arith.constant 0 : i32
    %c0_i32_1 = arith.constant 0 : i32
    return %c0_i32, %c0_i32_0 : i32, i32
  }
  func.func @transform_5(%arg0: i32, %arg1: i32) -> (i32, i32, i32) {
    %c0_i32 = arith.constant 0 : i32
    %c0_i32_0 = arith.constant 0 : i32
    return %arg1, %arg0, %c0_i32 : i32, i32, i32
  }
  func.func @transform_6(%arg0: i32, %arg1: i32) -> (i32, i32, i32, i32) {
    %c0_i32 = arith.constant 0 : i32
    %c0_i32_0 = arith.constant 0 : i32
    %c0_i32_1 = arith.constant 0 : i32
    return %arg1, %arg0, %c0_i32, %c0_i32_0 : i32, i32, i32, i32
  }
}

module attributes {stable_mosaic.version = 11 : i64} {
  func.func @_conv_tanh_stats_kernel(%arg0: i32, %arg1: i32, %arg2: memref<1x16x128xbf16, #tpu.memory_space<vmem>>, %arg3: memref<1x16x128xbf16, #tpu.memory_space<vmem>>, %arg4: memref<1x128xf32, #tpu.memory_space<vmem>>, %arg5: memref<640x128xbf16, #tpu.memory_space<vmem>>, %arg6: memref<1x128xf32, #tpu.memory_space<vmem>>, %arg7: memref<1x16x128xbf16, #tpu.memory_space<vmem>>, %arg8: memref<1x1x2x128xf32, #tpu.memory_space<vmem>>) attributes {dimension_semantics = [#tpu.dimension_semantics<parallel>, #tpu.dimension_semantics<parallel>], iteration_bounds = array<i64: 1, 2>, scalar_prefetch = 0 : i64, scratch_operands = 0 : i64, tpu.core_type = #tpu.core_type<tc>, window_params = [{transform_indices = @transform_0, window_bounds = array<i64: 1, 16, 128>}, {transform_indices = @transform_1, window_bounds = array<i64: 1, 16, 128>}, {pipeline_mode = #tpu.pipeline_mode<synchronous>, transform_indices = @transform_2, window_bounds = array<i64: 1, 128>}, {pipeline_mode = #tpu.pipeline_mode<synchronous>, transform_indices = @transform_3, window_bounds = array<i64: 640, 128>}, {pipeline_mode = #tpu.pipeline_mode<synchronous>, transform_indices = @transform_4, window_bounds = array<i64: 1, 128>}, {transform_indices = @transform_5, window_bounds = array<i64: 1, 16, 128>}, {transform_indices = @transform_6, window_bounds = array<i64: 1, 1, 2, 128>}]} {
    %c16_i32 = arith.constant 16 : i32
    %0 = arith.muli %arg0, %c16_i32 : i32
    %c0 = arith.constant 0 : index
    %c0_0 = arith.constant 0 : index
    %c0_1 = arith.constant 0 : index
    %1 = vector.load %arg2[%c0, %c0_0, %c0_1] : memref<1x16x128xbf16, #tpu.memory_space<vmem>>, vector<1x16x128xbf16>
    %2 = vector.shape_cast %1 : vector<1x16x128xbf16> to vector<16x128xbf16>
    %c0_2 = arith.constant 0 : index
    %c0_3 = arith.constant 0 : index
    %c0_4 = arith.constant 0 : index
    %3 = vector.load %arg3[%c0_2, %c0_3, %c0_4] : memref<1x16x128xbf16, #tpu.memory_space<vmem>>, vector<1x16x128xbf16>
    %4 = vector.shape_cast %3 : vector<1x16x128xbf16> to vector<16x128xbf16>
    %5 = tpu.concatenate %2, %4 in 0 : vector<16x128xbf16>, vector<16x128xbf16> -> vector<32x128xbf16>
    %6 = arith.extf %5 : vector<32x128xbf16> to vector<32x128xf32>
    %c0_5 = arith.constant 0 : index
    %c0_6 = arith.constant 0 : index
    %7 = vector.load %arg4[%c0_5, %c0_6] : memref<1x128xf32, #tpu.memory_space<vmem>>, vector<1x128xf32>
    %8 = vector.broadcast %7 : vector<1x128xf32> to vector<32x128xf32>
    %9 = arith.addf %6, %8 : vector<32x128xf32>
    %10 = tpu.iota {dimensions = array<i32: 0>} : vector<32x1xi32>
    %11 = vector.broadcast %0 : i32 to vector<32x1xi32>
    %12 = arith.addi %10, %11 : vector<32x1xi32>
    %c6_i32 = arith.constant 6 : i32
    %13 = vector.broadcast %c6_i32 : i32 to vector<32x1xi32>
    %14 = arith.cmpi sge, %12, %13 : vector<32x1xi32>
    %c14_i32 = arith.constant 14 : i32
    %15 = vector.broadcast %c14_i32 : i32 to vector<32x1xi32>
    %16 = arith.cmpi slt, %12, %15 : vector<32x1xi32>
    %17 = arith.andi %14, %16 : vector<32x1xi1>
    %cst = arith.constant 0.000000e+00 : f32
    %18 = vector.shape_cast %17 : vector<32x1xi1> to vector<32x1xi1>
    %19 = vector.broadcast %18 : vector<32x1xi1> to vector<32x128xi1>
    %20 = vector.broadcast %cst : f32 to vector<32x128xf32>
    %21 = arith.select %19, %9, %20 : vector<32x128xi1>, vector<32x128xf32>
    %22 = arith.truncf %21 : vector<32x128xf32> to vector<32x128xbf16>
    %23 = vector.extract_strided_slice %22 {offsets = [0, 0], sizes = [16, 128], strides = [1, 1]} : vector<32x128xbf16> to vector<16x128xbf16>
    %24 = vector.extract_strided_slice %22 {offsets = [1, 0], sizes = [16, 128], strides = [1, 1]} : vector<32x128xbf16> to vector<16x128xbf16>
    %25 = vector.extract_strided_slice %22 {offsets = [2, 0], sizes = [16, 128], strides = [1, 1]} : vector<32x128xbf16> to vector<16x128xbf16>
    %26 = vector.extract_strided_slice %22 {offsets = [3, 0], sizes = [16, 128], strides = [1, 1]} : vector<32x128xbf16> to vector<16x128xbf16>
    %27 = vector.extract_strided_slice %22 {offsets = [4, 0], sizes = [16, 128], strides = [1, 1]} : vector<32x128xbf16> to vector<16x128xbf16>
    %28 = tpu.concatenate %23, %24, %25, %26, %27 in 1 : vector<16x128xbf16>, vector<16x128xbf16>, vector<16x128xbf16>, vector<16x128xbf16>, vector<16x128xbf16> -> vector<16x640xbf16>
    %c0_7 = arith.constant 0 : index
    %c0_8 = arith.constant 0 : index
    %29 = vector.load %arg5[%c0_7, %c0_8] : memref<640x128xbf16, #tpu.memory_space<vmem>>, vector<640x128xbf16>
    %cst_9 = arith.constant dense<0.000000e+00> : vector<16x128xf32>
    %30 = tpu.matmul %28, %29, %cst_9 {dimension_numbers = #tpu.dot_dimension_numbers<[1], [0], [0], [1], [0, 0, 1, 1], [], []>} : vector<16x640xbf16>, vector<640x128xbf16>, vector<16x128xf32> -> vector<16x128xf32>
    %c0_10 = arith.constant 0 : index
    %c0_11 = arith.constant 0 : index
    %31 = vector.load %arg6[%c0_10, %c0_11] : memref<1x128xf32, #tpu.memory_space<vmem>>, vector<1x128xf32>
    %32 = vector.broadcast %31 : vector<1x128xf32> to vector<16x128xf32>
    %33 = arith.addf %30, %32 : vector<16x128xf32>
    %34 = math.tanh %33 : vector<16x128xf32>
    %35 = arith.truncf %34 : vector<16x128xf32> to vector<16x128xbf16>
    %c0_12 = arith.constant 0 : index
    %c0_13 = arith.constant 0 : index
    %c0_14 = arith.constant 0 : index
    %36 = vector.load %arg7[%c0_12, %c0_13, %c0_14] : memref<1x16x128xbf16, #tpu.memory_space<vmem>>, vector<1x16x128xbf16>
    %37 = vector.shape_cast %36 : vector<1x16x128xbf16> to vector<16x128xbf16>
    %38 = vector.shape_cast %35 : vector<16x128xbf16> to vector<1x16x128xbf16>
    tpu.vector_store %arg7[%c0_12, %c0_13, %c0_14], %38 {strides = array<i32>} : memref<1x16x128xbf16, #tpu.memory_space<vmem>>, vector<1x16x128xbf16>,
    %39 = tpu.iota {dimensions = array<i32: 0>} : vector<16x1xi32>
    %c16_i32_15 = arith.constant 16 : i32
    %40 = arith.muli %arg0, %c16_i32_15 : i32
    %41 = vector.broadcast %40 : i32 to vector<16x1xi32>
    %42 = arith.addi %39, %41 : vector<16x1xi32>
    %c4_i32 = arith.constant 4 : i32
    %43 = vector.broadcast %c4_i32 : i32 to vector<16x1xi32>
    %44 = arith.cmpi sge, %42, %43 : vector<16x1xi32>
    %c12_i32 = arith.constant 12 : i32
    %45 = vector.broadcast %c12_i32 : i32 to vector<16x1xi32>
    %46 = arith.cmpi slt, %42, %45 : vector<16x1xi32>
    %47 = arith.andi %44, %46 : vector<16x1xi1>
    %cst_16 = arith.constant 0.000000e+00 : f32
    %48 = vector.shape_cast %47 : vector<16x1xi1> to vector<16x1xi1>
    %49 = vector.broadcast %48 : vector<16x1xi1> to vector<16x128xi1>
    %50 = vector.broadcast %cst_16 : f32 to vector<16x128xf32>
    %51 = arith.select %49, %34, %50 : vector<16x128xi1>, vector<16x128xf32>
    %cst_17 = arith.constant dense<0.000000e+00> : vector<128xf32>
    %52 = vector.multi_reduction <add>, %51, %cst_17 [0] : vector<16x128xf32> to vector<128xf32>
    %53 = vector.shape_cast %52 : vector<128xf32> to vector<1x128xf32>
    %54 = arith.mulf %51, %51 : vector<16x128xf32>
    %cst_18 = arith.constant dense<0.000000e+00> : vector<128xf32>
    %55 = vector.multi_reduction <add>, %54, %cst_18 [0] : vector<16x128xf32> to vector<128xf32>
    %56 = vector.shape_cast %55 : vector<128xf32> to vector<1x128xf32>
    %57 = tpu.concatenate %53, %56 in 0 : vector<1x128xf32>, vector<1x128xf32> -> vector<2x128xf32>
    %c0_19 = arith.constant 0 : index
    %c0_20 = arith.constant 0 : index
    %c0_21 = arith.constant 0 : index
    %c0_22 = arith.constant 0 : index
    %58 = vector.load %arg8[%c0_19, %c0_20, %c0_21, %c0_22] : memref<1x1x2x128xf32, #tpu.memory_space<vmem>>, vector<1x1x2x128xf32>
    %59 = vector.shape_cast %58 : vector<1x1x2x128xf32> to vector<2x128xf32>
    %60 = vector.shape_cast %57 : vector<2x128xf32> to vector<1x1x2x128xf32>
    tpu.vector_store %arg8[%c0_19, %c0_20, %c0_21, %c0_22], %60 {strides = array<i32>} : memref<1x1x2x128xf32, #tpu.memory_space<vmem>>, vector<1x1x2x128xf32>,
    return
  }
  func.func @transform_0(%arg0: i32, %arg1: i32) -> (i32, i32, i32) {
    %c0_i32 = arith.constant 0 : i32
    %c0_i32_0 = arith.constant 0 : i32
    return %arg1, %arg0, %c0_i32 : i32, i32, i32
  }
  func.func @transform_1(%arg0: i32, %arg1: i32) -> (i32, i32, i32) {
    %c1_i32 = arith.constant 1 : i32
    %0 = arith.addi %arg0, %c1_i32 : i32
    %c1_i32_0 = arith.constant 1 : i32
    %1 = arith.muli %0, %c1_i32_0 : i32
    %c0_i32 = arith.constant 0 : i32
    %c0_i32_1 = arith.constant 0 : i32
    return %arg1, %1, %c0_i32 : i32, i32, i32
  }
  func.func @transform_2(%arg0: i32, %arg1: i32) -> (i32, i32) {
    %c0_i32 = arith.constant 0 : i32
    %c0_i32_0 = arith.constant 0 : i32
    %c0_i32_1 = arith.constant 0 : i32
    return %c0_i32, %c0_i32_0 : i32, i32
  }
  func.func @transform_3(%arg0: i32, %arg1: i32) -> (i32, i32) {
    %c0_i32 = arith.constant 0 : i32
    %c0_i32_0 = arith.constant 0 : i32
    %c0_i32_1 = arith.constant 0 : i32
    return %c0_i32, %c0_i32_0 : i32, i32
  }
  func.func @transform_4(%arg0: i32, %arg1: i32) -> (i32, i32) {
    %c0_i32 = arith.constant 0 : i32
    %c0_i32_0 = arith.constant 0 : i32
    %c0_i32_1 = arith.constant 0 : i32
    return %c0_i32, %c0_i32_0 : i32, i32
  }
  func.func @transform_5(%arg0: i32, %arg1: i32) -> (i32, i32, i32) {
    %c0_i32 = arith.constant 0 : i32
    %c0_i32_0 = arith.constant 0 : i32
    return %arg1, %arg0, %c0_i32 : i32, i32, i32
  }
  func.func @transform_6(%arg0: i32, %arg1: i32) -> (i32, i32, i32, i32) {
    %c0_i32 = arith.constant 0 : i32
    %c0_i32_0 = arith.constant 0 : i32
    %c0_i32_1 = arith.constant 0 : i32
    return %arg1, %arg0, %c0_i32, %c0_i32_0 : i32, i32, i32, i32
  }
}

module attributes {stable_mosaic.version = 11 : i64} {
  func.func @_conv_tanh_stats_kernel(%arg0: i32, %arg1: i32, %arg2: memref<1x16x128xbf16, #tpu.memory_space<vmem>>, %arg3: memref<1x16x128xbf16, #tpu.memory_space<vmem>>, %arg4: memref<1x128xf32, #tpu.memory_space<vmem>>, %arg5: memref<640x128xbf16, #tpu.memory_space<vmem>>, %arg6: memref<1x128xf32, #tpu.memory_space<vmem>>, %arg7: memref<1x16x128xbf16, #tpu.memory_space<vmem>>, %arg8: memref<1x1x2x128xf32, #tpu.memory_space<vmem>>) attributes {dimension_semantics = [#tpu.dimension_semantics<parallel>, #tpu.dimension_semantics<parallel>], iteration_bounds = array<i64: 1, 2>, scalar_prefetch = 0 : i64, scratch_operands = 0 : i64, tpu.core_type = #tpu.core_type<tc>, window_params = [{transform_indices = @transform_0, window_bounds = array<i64: 1, 16, 128>}, {transform_indices = @transform_1, window_bounds = array<i64: 1, 16, 128>}, {pipeline_mode = #tpu.pipeline_mode<synchronous>, transform_indices = @transform_2, window_bounds = array<i64: 1, 128>}, {pipeline_mode = #tpu.pipeline_mode<synchronous>, transform_indices = @transform_3, window_bounds = array<i64: 640, 128>}, {pipeline_mode = #tpu.pipeline_mode<synchronous>, transform_indices = @transform_4, window_bounds = array<i64: 1, 128>}, {transform_indices = @transform_5, window_bounds = array<i64: 1, 16, 128>}, {transform_indices = @transform_6, window_bounds = array<i64: 1, 1, 2, 128>}]} {
    %c16_i32 = arith.constant 16 : i32
    %0 = arith.muli %arg0, %c16_i32 : i32
    %c0 = arith.constant 0 : index
    %c0_0 = arith.constant 0 : index
    %c0_1 = arith.constant 0 : index
    %1 = vector.load %arg2[%c0, %c0_0, %c0_1] : memref<1x16x128xbf16, #tpu.memory_space<vmem>>, vector<1x16x128xbf16>
    %2 = vector.shape_cast %1 : vector<1x16x128xbf16> to vector<16x128xbf16>
    %c0_2 = arith.constant 0 : index
    %c0_3 = arith.constant 0 : index
    %c0_4 = arith.constant 0 : index
    %3 = vector.load %arg3[%c0_2, %c0_3, %c0_4] : memref<1x16x128xbf16, #tpu.memory_space<vmem>>, vector<1x16x128xbf16>
    %4 = vector.shape_cast %3 : vector<1x16x128xbf16> to vector<16x128xbf16>
    %5 = tpu.concatenate %2, %4 in 0 : vector<16x128xbf16>, vector<16x128xbf16> -> vector<32x128xbf16>
    %6 = arith.extf %5 : vector<32x128xbf16> to vector<32x128xf32>
    %c0_5 = arith.constant 0 : index
    %c0_6 = arith.constant 0 : index
    %7 = vector.load %arg4[%c0_5, %c0_6] : memref<1x128xf32, #tpu.memory_space<vmem>>, vector<1x128xf32>
    %8 = vector.broadcast %7 : vector<1x128xf32> to vector<32x128xf32>
    %9 = arith.addf %6, %8 : vector<32x128xf32>
    %10 = tpu.iota {dimensions = array<i32: 0>} : vector<32x1xi32>
    %11 = vector.broadcast %0 : i32 to vector<32x1xi32>
    %12 = arith.addi %10, %11 : vector<32x1xi32>
    %c4_i32 = arith.constant 4 : i32
    %13 = vector.broadcast %c4_i32 : i32 to vector<32x1xi32>
    %14 = arith.cmpi sge, %12, %13 : vector<32x1xi32>
    %c12_i32 = arith.constant 12 : i32
    %15 = vector.broadcast %c12_i32 : i32 to vector<32x1xi32>
    %16 = arith.cmpi slt, %12, %15 : vector<32x1xi32>
    %17 = arith.andi %14, %16 : vector<32x1xi1>
    %cst = arith.constant 0.000000e+00 : f32
    %18 = vector.shape_cast %17 : vector<32x1xi1> to vector<32x1xi1>
    %19 = vector.broadcast %18 : vector<32x1xi1> to vector<32x128xi1>
    %20 = vector.broadcast %cst : f32 to vector<32x128xf32>
    %21 = arith.select %19, %9, %20 : vector<32x128xi1>, vector<32x128xf32>
    %22 = arith.truncf %21 : vector<32x128xf32> to vector<32x128xbf16>
    %23 = vector.extract_strided_slice %22 {offsets = [0, 0], sizes = [16, 128], strides = [1, 1]} : vector<32x128xbf16> to vector<16x128xbf16>
    %24 = vector.extract_strided_slice %22 {offsets = [1, 0], sizes = [16, 128], strides = [1, 1]} : vector<32x128xbf16> to vector<16x128xbf16>
    %25 = vector.extract_strided_slice %22 {offsets = [2, 0], sizes = [16, 128], strides = [1, 1]} : vector<32x128xbf16> to vector<16x128xbf16>
    %26 = vector.extract_strided_slice %22 {offsets = [3, 0], sizes = [16, 128], strides = [1, 1]} : vector<32x128xbf16> to vector<16x128xbf16>
    %27 = vector.extract_strided_slice %22 {offsets = [4, 0], sizes = [16, 128], strides = [1, 1]} : vector<32x128xbf16> to vector<16x128xbf16>
    %28 = tpu.concatenate %23, %24, %25, %26, %27 in 1 : vector<16x128xbf16>, vector<16x128xbf16>, vector<16x128xbf16>, vector<16x128xbf16>, vector<16x128xbf16> -> vector<16x640xbf16>
    %c0_7 = arith.constant 0 : index
    %c0_8 = arith.constant 0 : index
    %29 = vector.load %arg5[%c0_7, %c0_8] : memref<640x128xbf16, #tpu.memory_space<vmem>>, vector<640x128xbf16>
    %cst_9 = arith.constant dense<0.000000e+00> : vector<16x128xf32>
    %30 = tpu.matmul %28, %29, %cst_9 {dimension_numbers = #tpu.dot_dimension_numbers<[1], [0], [0], [1], [0, 0, 1, 1], [], []>} : vector<16x640xbf16>, vector<640x128xbf16>, vector<16x128xf32> -> vector<16x128xf32>
    %c0_10 = arith.constant 0 : index
    %c0_11 = arith.constant 0 : index
    %31 = vector.load %arg6[%c0_10, %c0_11] : memref<1x128xf32, #tpu.memory_space<vmem>>, vector<1x128xf32>
    %32 = vector.broadcast %31 : vector<1x128xf32> to vector<16x128xf32>
    %33 = arith.addf %30, %32 : vector<16x128xf32>
    %34 = math.tanh %33 : vector<16x128xf32>
    %35 = arith.truncf %34 : vector<16x128xf32> to vector<16x128xbf16>
    %c0_12 = arith.constant 0 : index
    %c0_13 = arith.constant 0 : index
    %c0_14 = arith.constant 0 : index
    %36 = vector.load %arg7[%c0_12, %c0_13, %c0_14] : memref<1x16x128xbf16, #tpu.memory_space<vmem>>, vector<1x16x128xbf16>
    %37 = vector.shape_cast %36 : vector<1x16x128xbf16> to vector<16x128xbf16>
    %38 = vector.shape_cast %35 : vector<16x128xbf16> to vector<1x16x128xbf16>
    tpu.vector_store %arg7[%c0_12, %c0_13, %c0_14], %38 {strides = array<i32>} : memref<1x16x128xbf16, #tpu.memory_space<vmem>>, vector<1x16x128xbf16>,
    %39 = tpu.iota {dimensions = array<i32: 0>} : vector<16x1xi32>
    %c16_i32_15 = arith.constant 16 : i32
    %40 = arith.muli %arg0, %c16_i32_15 : i32
    %41 = vector.broadcast %40 : i32 to vector<16x1xi32>
    %42 = arith.addi %39, %41 : vector<16x1xi32>
    %c2_i32 = arith.constant 2 : i32
    %43 = vector.broadcast %c2_i32 : i32 to vector<16x1xi32>
    %44 = arith.cmpi sge, %42, %43 : vector<16x1xi32>
    %c10_i32 = arith.constant 10 : i32
    %45 = vector.broadcast %c10_i32 : i32 to vector<16x1xi32>
    %46 = arith.cmpi slt, %42, %45 : vector<16x1xi32>
    %47 = arith.andi %44, %46 : vector<16x1xi1>
    %cst_16 = arith.constant 0.000000e+00 : f32
    %48 = vector.shape_cast %47 : vector<16x1xi1> to vector<16x1xi1>
    %49 = vector.broadcast %48 : vector<16x1xi1> to vector<16x128xi1>
    %50 = vector.broadcast %cst_16 : f32 to vector<16x128xf32>
    %51 = arith.select %49, %34, %50 : vector<16x128xi1>, vector<16x128xf32>
    %cst_17 = arith.constant dense<0.000000e+00> : vector<128xf32>
    %52 = vector.multi_reduction <add>, %51, %cst_17 [0] : vector<16x128xf32> to vector<128xf32>
    %53 = vector.shape_cast %52 : vector<128xf32> to vector<1x128xf32>
    %54 = arith.mulf %51, %51 : vector<16x128xf32>
    %cst_18 = arith.constant dense<0.000000e+00> : vector<128xf32>
    %55 = vector.multi_reduction <add>, %54, %cst_18 [0] : vector<16x128xf32> to vector<128xf32>
    %56 = vector.shape_cast %55 : vector<128xf32> to vector<1x128xf32>
    %57 = tpu.concatenate %53, %56 in 0 : vector<1x128xf32>, vector<1x128xf32> -> vector<2x128xf32>
    %c0_19 = arith.constant 0 : index
    %c0_20 = arith.constant 0 : index
    %c0_21 = arith.constant 0 : index
    %c0_22 = arith.constant 0 : index
    %58 = vector.load %arg8[%c0_19, %c0_20, %c0_21, %c0_22] : memref<1x1x2x128xf32, #tpu.memory_space<vmem>>, vector<1x1x2x128xf32>
    %59 = vector.shape_cast %58 : vector<1x1x2x128xf32> to vector<2x128xf32>
    %60 = vector.shape_cast %57 : vector<2x128xf32> to vector<1x1x2x128xf32>
    tpu.vector_store %arg8[%c0_19, %c0_20, %c0_21, %c0_22], %60 {strides = array<i32>} : memref<1x1x2x128xf32, #tpu.memory_space<vmem>>, vector<1x1x2x128xf32>,
    return
  }
  func.func @transform_0(%arg0: i32, %arg1: i32) -> (i32, i32, i32) {
    %c0_i32 = arith.constant 0 : i32
    %c0_i32_0 = arith.constant 0 : i32
    return %arg1, %arg0, %c0_i32 : i32, i32, i32
  }
  func.func @transform_1(%arg0: i32, %arg1: i32) -> (i32, i32, i32) {
    %c1_i32 = arith.constant 1 : i32
    %0 = arith.addi %arg0, %c1_i32 : i32
    %c1_i32_0 = arith.constant 1 : i32
    %1 = arith.muli %0, %c1_i32_0 : i32
    %c0_i32 = arith.constant 0 : i32
    %c0_i32_1 = arith.constant 0 : i32
    return %arg1, %1, %c0_i32 : i32, i32, i32
  }
  func.func @transform_2(%arg0: i32, %arg1: i32) -> (i32, i32) {
    %c0_i32 = arith.constant 0 : i32
    %c0_i32_0 = arith.constant 0 : i32
    %c0_i32_1 = arith.constant 0 : i32
    return %c0_i32, %c0_i32_0 : i32, i32
  }
  func.func @transform_3(%arg0: i32, %arg1: i32) -> (i32, i32) {
    %c0_i32 = arith.constant 0 : i32
    %c0_i32_0 = arith.constant 0 : i32
    %c0_i32_1 = arith.constant 0 : i32
    return %c0_i32, %c0_i32_0 : i32, i32
  }
  func.func @transform_4(%arg0: i32, %arg1: i32) -> (i32, i32) {
    %c0_i32 = arith.constant 0 : i32
    %c0_i32_0 = arith.constant 0 : i32
    %c0_i32_1 = arith.constant 0 : i32
    return %c0_i32, %c0_i32_0 : i32, i32
  }
  func.func @transform_5(%arg0: i32, %arg1: i32) -> (i32, i32, i32) {
    %c0_i32 = arith.constant 0 : i32
    %c0_i32_0 = arith.constant 0 : i32
    return %arg1, %arg0, %c0_i32 : i32, i32, i32
  }
  func.func @transform_6(%arg0: i32, %arg1: i32) -> (i32, i32, i32, i32) {
    %c0_i32 = arith.constant 0 : i32
    %c0_i32_0 = arith.constant 0 : i32
    %c0_i32_1 = arith.constant 0 : i32
    return %arg1, %arg0, %c0_i32, %c0_i32_0 : i32, i32, i32, i32
  }
}

module attributes {stable_mosaic.version = 11 : i64} {
  func.func @_conv_final_kernel(%arg0: i32, %arg1: i32, %arg2: memref<1x16x128xbf16, #tpu.memory_space<vmem>>, %arg3: memref<1x16x128xbf16, #tpu.memory_space<vmem>>, %arg4: memref<1x128xf32, #tpu.memory_space<vmem>>, %arg5: memref<640x128xbf16, #tpu.memory_space<vmem>>, %arg6: memref<1x128xf32, #tpu.memory_space<vmem>>, %arg7: memref<1x16x128xf32, #tpu.memory_space<vmem>>) attributes {dimension_semantics = [#tpu.dimension_semantics<parallel>, #tpu.dimension_semantics<parallel>], iteration_bounds = array<i64: 1, 2>, scalar_prefetch = 0 : i64, scratch_operands = 0 : i64, tpu.core_type = #tpu.core_type<tc>, window_params = [{transform_indices = @transform_0, window_bounds = array<i64: 1, 16, 128>}, {transform_indices = @transform_1, window_bounds = array<i64: 1, 16, 128>}, {pipeline_mode = #tpu.pipeline_mode<synchronous>, transform_indices = @transform_2, window_bounds = array<i64: 1, 128>}, {pipeline_mode = #tpu.pipeline_mode<synchronous>, transform_indices = @transform_3, window_bounds = array<i64: 640, 128>}, {pipeline_mode = #tpu.pipeline_mode<synchronous>, transform_indices = @transform_4, window_bounds = array<i64: 1, 128>}, {transform_indices = @transform_5, window_bounds = array<i64: 1, 16, 128>}]} {
    %c16_i32 = arith.constant 16 : i32
    %0 = arith.muli %arg0, %c16_i32 : i32
    %c0 = arith.constant 0 : index
    %c0_0 = arith.constant 0 : index
    %c0_1 = arith.constant 0 : index
    %1 = vector.load %arg2[%c0, %c0_0, %c0_1] : memref<1x16x128xbf16, #tpu.memory_space<vmem>>, vector<1x16x128xbf16>
    %2 = vector.shape_cast %1 : vector<1x16x128xbf16> to vector<16x128xbf16>
    %c0_2 = arith.constant 0 : index
    %c0_3 = arith.constant 0 : index
    %c0_4 = arith.constant 0 : index
    %3 = vector.load %arg3[%c0_2, %c0_3, %c0_4] : memref<1x16x128xbf16, #tpu.memory_space<vmem>>, vector<1x16x128xbf16>
    %4 = vector.shape_cast %3 : vector<1x16x128xbf16> to vector<16x128xbf16>
    %5 = tpu.concatenate %2, %4 in 0 : vector<16x128xbf16>, vector<16x128xbf16> -> vector<32x128xbf16>
    %6 = arith.extf %5 : vector<32x128xbf16> to vector<32x128xf32>
    %c0_5 = arith.constant 0 : index
    %c0_6 = arith.constant 0 : index
    %7 = vector.load %arg4[%c0_5, %c0_6] : memref<1x128xf32, #tpu.memory_space<vmem>>, vector<1x128xf32>
    %8 = vector.broadcast %7 : vector<1x128xf32> to vector<32x128xf32>
    %9 = arith.addf %6, %8 : vector<32x128xf32>
    %10 = tpu.iota {dimensions = array<i32: 0>} : vector<32x1xi32>
    %11 = vector.broadcast %0 : i32 to vector<32x1xi32>
    %12 = arith.addi %10, %11 : vector<32x1xi32>
    %c2_i32 = arith.constant 2 : i32
    %13 = vector.broadcast %c2_i32 : i32 to vector<32x1xi32>
    %14 = arith.cmpi sge, %12, %13 : vector<32x1xi32>
    %c10_i32 = arith.constant 10 : i32
    %15 = vector.broadcast %c10_i32 : i32 to vector<32x1xi32>
    %16 = arith.cmpi slt, %12, %15 : vector<32x1xi32>
    %17 = arith.andi %14, %16 : vector<32x1xi1>
    %cst = arith.constant 0.000000e+00 : f32
    %18 = vector.shape_cast %17 : vector<32x1xi1> to vector<32x1xi1>
    %19 = vector.broadcast %18 : vector<32x1xi1> to vector<32x128xi1>
    %20 = vector.broadcast %cst : f32 to vector<32x128xf32>
    %21 = arith.select %19, %9, %20 : vector<32x128xi1>, vector<32x128xf32>
    %22 = arith.truncf %21 : vector<32x128xf32> to vector<32x128xbf16>
    %23 = vector.extract_strided_slice %22 {offsets = [0, 0], sizes = [16, 128], strides = [1, 1]} : vector<32x128xbf16> to vector<16x128xbf16>
    %24 = vector.extract_strided_slice %22 {offsets = [1, 0], sizes = [16, 128], strides = [1, 1]} : vector<32x128xbf16> to vector<16x128xbf16>
    %25 = vector.extract_strided_slice %22 {offsets = [2, 0], sizes = [16, 128], strides = [1, 1]} : vector<32x128xbf16> to vector<16x128xbf16>
    %26 = vector.extract_strided_slice %22 {offsets = [3, 0], sizes = [16, 128], strides = [1, 1]} : vector<32x128xbf16> to vector<16x128xbf16>
    %27 = vector.extract_strided_slice %22 {offsets = [4, 0], sizes = [16, 128], strides = [1, 1]} : vector<32x128xbf16> to vector<16x128xbf16>
    %28 = tpu.concatenate %23, %24, %25, %26, %27 in 1 : vector<16x128xbf16>, vector<16x128xbf16>, vector<16x128xbf16>, vector<16x128xbf16>, vector<16x128xbf16> -> vector<16x640xbf16>
    %c0_7 = arith.constant 0 : index
    %c0_8 = arith.constant 0 : index
    %29 = vector.load %arg5[%c0_7, %c0_8] : memref<640x128xbf16, #tpu.memory_space<vmem>>, vector<640x128xbf16>
    %cst_9 = arith.constant dense<0.000000e+00> : vector<16x128xf32>
    %30 = tpu.matmul %28, %29, %cst_9 {dimension_numbers = #tpu.dot_dimension_numbers<[1], [0], [0], [1], [0, 0, 1, 1], [], []>} : vector<16x640xbf16>, vector<640x128xbf16>, vector<16x128xf32> -> vector<16x128xf32>
    %c0_10 = arith.constant 0 : index
    %c0_11 = arith.constant 0 : index
    %31 = vector.load %arg6[%c0_10, %c0_11] : memref<1x128xf32, #tpu.memory_space<vmem>>, vector<1x128xf32>
    %32 = vector.broadcast %31 : vector<1x128xf32> to vector<16x128xf32>
    %33 = arith.addf %30, %32 : vector<16x128xf32>
    %c0_12 = arith.constant 0 : index
    %c0_13 = arith.constant 0 : index
    %c0_14 = arith.constant 0 : index
    %34 = vector.load %arg7[%c0_12, %c0_13, %c0_14] : memref<1x16x128xf32, #tpu.memory_space<vmem>>, vector<1x16x128xf32>
    %35 = vector.shape_cast %34 : vector<1x16x128xf32> to vector<16x128xf32>
    %36 = vector.shape_cast %33 : vector<16x128xf32> to vector<1x16x128xf32>
    tpu.vector_store %arg7[%c0_12, %c0_13, %c0_14], %36 {strides = array<i32>} : memref<1x16x128xf32, #tpu.memory_space<vmem>>, vector<1x16x128xf32>,
    return
  }
  func.func @transform_0(%arg0: i32, %arg1: i32) -> (i32, i32, i32) {
    %c0_i32 = arith.constant 0 : i32
    %c0_i32_0 = arith.constant 0 : i32
    return %arg1, %arg0, %c0_i32 : i32, i32, i32
  }
  func.func @transform_1(%arg0: i32, %arg1: i32) -> (i32, i32, i32) {
    %c1_i32 = arith.constant 1 : i32
    %0 = arith.addi %arg0, %c1_i32 : i32
    %c1_i32_0 = arith.constant 1 : i32
    %1 = arith.muli %0, %c1_i32_0 : i32
    %c0_i32 = arith.constant 0 : i32
    %c0_i32_1 = arith.constant 0 : i32
    return %arg1, %1, %c0_i32 : i32, i32, i32
  }
  func.func @transform_2(%arg0: i32, %arg1: i32) -> (i32, i32) {
    %c0_i32 = arith.constant 0 : i32
    %c0_i32_0 = arith.constant 0 : i32
    %c0_i32_1 = arith.constant 0 : i32
    return %c0_i32, %c0_i32_0 : i32, i32
  }
  func.func @transform_3(%arg0: i32, %arg1: i32) -> (i32, i32) {
    %c0_i32 = arith.constant 0 : i32
    %c0_i32_0 = arith.constant 0 : i32
    %c0_i32_1 = arith.constant 0 : i32
    return %c0_i32, %c0_i32_0 : i32, i32
  }
  func.func @transform_4(%arg0: i32, %arg1: i32) -> (i32, i32) {
    %c0_i32 = arith.constant 0 : i32
    %c0_i32_0 = arith.constant 0 : i32
    %c0_i32_1 = arith.constant 0 : i32
    return %c0_i32, %c0_i32_0 : i32, i32
  }
  func.func @transform_5(%arg0: i32, %arg1: i32) -> (i32, i32, i32) {
    %c0_i32 = arith.constant 0 : i32
    %c0_i32_0 = arith.constant 0 : i32
    return %arg1, %arg0, %c0_i32 : i32, i32, i32
  }
}

</mosaic_0001>

<bundles_post_ra>
// kernel: decoder_postnet.6
= control target key start
LH: loop header
LB: loop body
LE: loop exit
PB: predicated region body
PF: predicated region fallthrough
CT: control target
= control target key end

     0   :  { %s1354_s21 = smov 0   ;;  %s1356_s22 = smov 0   ;;  %s1537_s0 = inlined_call_operand.vmem [shape: bf16[2,32,128], index: 0, kind: input, shape index: {}, may-alias: {0,1}]   ;;  %s1538_s1 = inlined_call_operand.vmem [shape: bf16[2,32,128], index: 1, kind: input, shape index: {}, may-alias: {0,1}]   ;;  %s1539_s2 = inlined_call_operand.vmem [shape: f32[1,128], index: 2, kind: input, shape index: {}]   ;;  %s1540_s3 = inlined_call_operand.vmem [shape: bf16[640,128], index: 3, kind: input, shape index: {}]   ;;  %s1541_s4 = inlined_call_operand.vmem [shape: f32[1,128], index: 4, kind: input, shape index: {}]   ;;  %s1542_s5 = inlined_call_operand.vmem [shape: bf16[2,32,128], index: 5, kind: output, shape index: {0}]   ;;  %s1543_s6 = inlined_call_operand.vmem [shape: f32[2,1,2,128], index: 6, kind: output, shape index: {1}]  }
   0x1   :  { %s1358_s1 = smov 0  }
   0x2 LB: > { %s26_s23 = sadd.s32 1, %s1312_s22  ;;  %p1034_p0 = scmp.ge.s32.totalorder %s1316_s1, 1  ;;  %s1316_s1 = sphi %s1358_s1, %s17_s1   ;;  %s1312_s22 = sphi %s1356_s22, %s1545_s22   ;;  %s1308_s21 = sphi %s1354_s21, %s1544_s21  }
   0x3   : > { %p27_p1 = scmp.ge.s32.totalorder %s26_s23, 2  ;;  %p259_p2 = scmp.lt.s32.totalorder %s1316_s1, 3 }
   0x5   : > { %s1547_s23 = smov (%p27_p1, %s26_s23), 0  ;;  %p260_p3 = pnand %p1034_p0, %p259_p2 }
   0x6   : > { %p315_p4 = scmp.lt.s32.totalorder (!%p260_p3), %s1308_s21, 1 }
   0x7   : > { %263 = sbr.rel (%p260_p3) target bundleno = 238 (0xee), region = 40 }
   0xc   : > { %v1225_v0 = vld [vmem:[%s1540_s3 + $0x38] sm:$0xff]  ;;  %v1224_v4 = vld [vmem:[%s1540_s3 + $0x30] sm:$0xff]  ;;  %s1549_s21 = smov (!%p315_p4, %s1308_s21), 1  ;;  %v1223_v8 = vld [vmem:[%s1540_s3 + $0x28] sm:$0xff]  ;;  %v1318_v18 = vmov 0.0|0.0   ;;  %vm432_vm0 = vcmask 1046528  }
   0xd   : > { %v1241_v1 = vld [vmem:[%s1540_s3 + $0xb8] sm:$0xff]  ;;  %777 = vmatpush.bf16.msra.mxu0 %v1225_v0  ;;  %v1240_v5 = vld [vmem:[%s1540_s3 + $0xb0] sm:$0xff]  ;;  %s1212_s16 = sshll.u32 %s1549_s21, 4  ;;  %v1239_v9 = vld [vmem:[%s1540_s3 + $0xa8] sm:$0xff]  ;;  %v411_v19 = vunpack.c.l.b16 %v1318_v18  ;;  %vm437_vm1 = vsmask.f32 6400 }
   0xe   : > { %v1249_v2 = vld [vmem:[%s1540_s3 + $0xf8] sm:$0xff]  ;;  %805 = vmatpush.bf16.msra.mxu2 %v1241_v1  ;;  %v1248_v6 = vld [vmem:[%s1540_s3 + $0xf0] sm:$0xff]  ;;  %v1247_v10 = vld [vmem:[%s1540_s3 + $0xe8] sm:$0xff]  ;;  %s322_s30 = scalar_lea.vmem %s1537_s0, %s1212_s16  ;;  %vm418_vm2 = vsmask.f32 7424  ;;  %vm448_vm3 = vcmask 1045504   ;;  %s344_s9 = scalar_lea.vmem %s1542_s5, %s1212_s16 }
   0xf   : > { %v1233_v3 = vld [vmem:[%s1540_s3 + $0x78] sm:$0xff]  ;;  %819 = vmatpush.bf16.msra.mxu3 %v1249_v2  ;;  %v1232_v7 = vld [vmem:[%s1540_s3 + $0x70] sm:$0xff]  ;;  %v1231_v11 = vld [vmem:[%s1540_s3 + $0x68] sm:$0xff]  ;;  %v1443_v26 = vpack.c.b16 %v411_v19, %v411_v19  ;;  %s1041_s10 = sshll.u32 %s1549_s21, 1  ;;  %vm881_vm6 = vcmask 1040384  }
  0x10   : > { %791 = vmatpush.bf16.msra.mxu1 %v1233_v3  ;;  %v1222_v12 = vld [vmem:[%s1540_s3 + $0x20] sm:$0xff]  ;;  %v1221_v21 = vld [vmem:[%s1540_s3 + $0x18] sm:$0xff]  ;;  %v1220_v28 = vld [vmem:[%s1540_s3 + $0x10] sm:$0xff]  ;;  %s352_s12 = scalar_lea.vmem %s1543_s6, %s1041_s10 }
  0x11   : > { %778 = vmatpush.bf16.msra.mxu0 %v1224_v4  ;;  %v1238_v13 = vld [vmem:[%s1540_s3 + $0xa0] sm:$0xff]  ;;  %v1237_v22 = vld [vmem:[%s1540_s3 + $0x98] sm:$0xff]  ;;  %v1236_v29 = vld [vmem:[%s1540_s3 + $0x90] sm:$0xff]  ;;  %v427_v33 = vshll.u32 %v1443_v26, 16  ;;  %v441_v34 = vshrl.u32 %v1443_v26, 16  ;;  %v434_v50 = vrot.slane %v1443_v26, 1 }
  0x12   : > { %806 = vmatpush.bf16.msra.mxu2 %v1240_v5  ;;  %v1246_v14 = vld [vmem:[%s1540_s3 + $0xe0] sm:$0xff]  ;;  %v1245_v23 = vld [vmem:[%s1540_s3 + $0xd8] sm:$0xff]  ;;  %v1244_v30 = vld [vmem:[%s1540_s3 + $0xd0] sm:$0xff]  ;;  %v450_v5 = vrot.slane %v1443_v26, 2 }
  0x13   : > { %820 = vmatpush.bf16.msra.mxu3 %v1248_v6  ;;  %v1230_v15 = vld [vmem:[%s1540_s3 + $0x60] sm:$0xff]  ;;  %v1229_v24 = vld [vmem:[%s1540_s3 + $0x58] sm:$0xff]  ;;  %v1228_v31 = vld [vmem:[%s1540_s3 + $0x50] sm:$0xff]  ;;  %v443_v42 = vrot.slane %v441_v34, 1  ;;  %v444_v43 = vrot.slane %v427_v33, 2  ;;  %v429_v57 = vrot.slane %v427_v33, 1 }
  0x14   : > { %792 = vmatpush.bf16.msra.mxu1 %v1232_v7  ;;  %v1216_v16 = vld [vmem:[%s322_s30] sm:$0xff]  ;;  %v1219_v36 = vld [vmem:[%s1540_s3 + $0x8] sm:$0xff]  ;;  %v1257_v51 = vld [vmem:[%s1540_s3 + $0x138] sm:$0xff] }
  0x15   : > { %779 = vmatpush.bf16.msra.mxu0 %v1223_v8  ;;  %v1288_v17 = vld [vmem:[%s1539_s2] ss:$0 sm:$0xff]  ;;  %v371_v20 = vunpack.c.h.bf16 %v1216_v16  ;;  %v1235_v37 = vld [vmem:[%s1540_s3 + $0x88] sm:$0xff]  ;;  %v445_v54 = vor.u32 %v444_v43, %v443_v42  ;;  %v1256_v59 = vld [vmem:[%s1540_s3 + $0x130] sm:$0xff] }
  0x16   : > { %807 = vmatpush.bf16.msra.mxu2 %v1239_v9  ;;  %v1243_v38 = vld [vmem:[%s1540_s3 + $0xc8] sm:$0xff]  ;;  %v1218_v47 = vld [vmem:[%s1540_s3] sm:$0xff]  ;;  %v1253_v0 = vld [vmem:[%s1540_s3 + $0x118] sm:$0xff] }
  0x17   : > { %821 = vmatpush.bf16.msra.mxu3 %v1247_v10  ;;  %v378_v25 = vadd.f32 %v1288_v17, %v371_v20  ;;  %v1227_v39 = vld [vmem:[%s1540_s3 + $0x48] sm:$0xff]  ;;  %v1234_v48 = vld [vmem:[%s1540_s3 + $0x80] sm:$0xff]  ;;  %v1252_v1 = vld [vmem:[%s1540_s3 + $0x110] sm:$0xff] }
  0x18   : > { %793 = vmatpush.bf16.msra.mxu1 %v1231_v11  ;;  %v1242_v52 = vld [vmem:[%s1540_s3 + $0xc0] sm:$0xff]  ;;  %v1255_v62 = vld [vmem:[%s1540_s3 + $0x128] sm:$0xff] }
  0x19   : > { %780 = vmatpush.bf16.msra.mxu0 %v1222_v12  ;;  %v407_v27 = vpack.c.bf16 %v378_v25, %v378_v25  ;;  %v1226_v55 = vld [vmem:[%s1540_s3 + $0x40] sm:$0xff]  ;;  %v1251_v2 = vld [vmem:[%s1540_s3 + $0x108] sm:$0xff]  ;;  %v380_v25 = vlaneseq }
  0x1a   : > { %808 = vmatpush.bf16.msra.mxu2 %v1238_v13  ;;  %v1254_v63 = vld [vmem:[%s1540_s3 + $0x120] sm:$0xff] }
  0x1b   : > { %822 = vmatpush.bf16.msra.mxu3 %v1246_v14  ;;  %v412_v32 = vunpack.c.l.b16 %v407_v27  ;;  %v1250_v3 = vld [vmem:[%s1540_s3 + $0x100] sm:$0xff] }
  0x1c   : > { %794 = vmatpush.bf16.msra.mxu1 %v1230_v15  ;;  %v1289_v8 = vld [vmem:[%s1541_s4] ss:$0 sm:$0xff] }
  0x1d   : > { %781 = vmatpush.bf16.msra.mxu0 %v1221_v21  ;;  %v1459_v35 = vpack.c.b16 %v412_v32, %v411_v19 }
  0x1e   : > { %809 = vmatpush.bf16.msra.mxu2 %v1237_v22 }
  0x1f   : > { %823 = vmatpush.bf16.msra.mxu3 %v1245_v23  ;;  %v420_v40 = vshrl.u32 %v1459_v35, 16  ;;  %v422_v41 = vshll.u32 %v1459_v35, 16  ;;  %v433_v49 = vrot.slane %v1459_v35, 1  ;;  %v449_v4 = vrot.slane %v1459_v35, 2 }
  0x20   : > { %795 = vmatpush.bf16.msra.mxu1 %v1229_v24 }
  0x21   : > { %782 = vmatpush.bf16.msra.mxu0 %v1220_v28  ;;  %v438_v44 = vrot.slane %v420_v40, 1  ;;  %v439_v45 = vrot.slane %v422_v41, 2  ;;  %v424_v46 = vrot.slane %v422_v41, 1  ;;  %v435_v58 = vsel %vm432_vm0, %v433_v49, %v434_v50 }
  0x22   : > { %810 = vmatpush.bf16.msra.mxu2 %v1236_v29  ;;  %v451_v6 = vsel %vm448_vm3, %v449_v4, %v450_v5  ;;  %v381_v28 = vshrl.u32 %v380_v25, 7 }
  0x23   : > { %824 = vmatpush.bf16.msra.mxu3 %v1244_v30  ;;  %v440_v53 = vor.u32 %v439_v45, %v438_v44  ;;  %v425_v56 = vor.u32 %v424_v46, %v420_v40 }
  0x24   : > { %796 = vmatpush.bf16.msra.mxu1 %v1228_v31  ;;  %v382_v30 = vadd.s32 8, %v381_v28  ;;  %vm853_vm4 = vcmp.ge.s32.totalorder %v381_v28, 6 }
  0x25   : > { %783 = vmatpush.bf16.msra.mxu0 %v1219_v36  ;;  %v446_v60 = vsel %vm437_vm1, %v440_v53, %v445_v54  ;;  %v430_v61 = vsel %vm418_vm2, %v425_v56, %v429_v57 }
  0x26   : > { %811 = vmatpush.bf16.msra.mxu2 %v1235_v37  ;;  %vm856_vm5 = vcmp.lt.s32.totalorder %v382_v30, 14 }
  0x27   : > { %825 = vmatpush.bf16.msra.mxu3 %v1243_v38 }
  0x28   : > { %797 = vmatpush.bf16.msra.mxu1 %v1227_v39 }
  0x29   : > { %784 = vmatpush.bf16.msra.mxu0 %v1218_v47 }
  0x2a   : > { %812 = vmatpush.bf16.msra.mxu2 %v1234_v48 }
  0x2b   : > { %826 = vmatpush.bf16.msra.mxu3 %v1242_v52 }
  0x2c   : > { %798 = vmatpush.bf16.msra.mxu1 %v1226_v55  ;;  %785 = vmatmul.bf16.vlgmr.msra.gmra.mxu0 %v1459_v35 }
  0x2d   : > { %833 = vmatpush.bf16.msrb.mxu0 %v1257_v51  ;;  %813 = vmatmul.bf16.vlgmr.msra.gmra.mxu2 %v435_v58 }
  0x2e   : > { %827 = vmatmul.bf16.vlgmr.msra.gmra.mxu3 %v446_v60 }
  0x2f   : > { %799 = vmatmul.bf16.vlgmr.msra.gmra.mxu1 %v430_v61 }
  0x31   : > { %834 = vmatpush.bf16.msrb.mxu0 %v1256_v59 }
  0x35   : > { %835 = vmatpush.bf16.msrb.mxu0 %v1255_v62 }
  0x39   : > { %836 = vmatpush.bf16.msrb.mxu0 %v1254_v63 }
  0x3d   : > { %837 = vmatpush.bf16.msrb.mxu0 %v1253_v0 }
  0x41   : > { %838 = vmatpush.bf16.msrb.mxu0 %v1252_v1 }
  0x45   : > { %839 = vmatpush.bf16.msrb.mxu0 %v1251_v2 }
  0x49   : > { %840 = vmatpush.bf16.msrb.mxu0 %v1250_v3 }
  0x4c   : > { %841 = vmatmul.bf16.vlgmr.msrb.gmra.mxu0 %v451_v6 }
  0xa9   : > { %v786_v7 = vpop.f32.mrf.mxu0 }
  0xaa   : > { %v787_v10 = vadd.f32 %v1289_v8, %v786_v7 }
  0xac   : > { %v800_v9 = vpop.f32.mrf.mxu1 }
  0xad   : > { %v801_v13 = vadd.f32 %v800_v9, %v787_v10 }
  0xb0   : > { %v814_v11 = vpop.f32.mrf.mxu2 }
  0xb1   : > { %v788_v12 = vpop.f32.mrf.mxu0  ;;  %v828_v14 = vpop.f32.mrf.mxu3  ;;  %v815_v17 = vadd.f32 %v814_v11, %v801_v13 }
  0xb2   : > { %v789_v15 = vadd.f32 %v1289_v8, %v788_v12 }
  0xb3   : > { %v829_v21 = vadd.f32 %v828_v14, %v815_v17 }
  0xb4   : > { %v802_v16 = vpop.f32.mrf.mxu1 }
  0xb5   : > { %v803_v18 = vadd.f32 %v802_v16, %v789_v15 }
  0xb8   : > { %v816_v19 = vpop.f32.mrf.mxu2 }
  0xb9   : > { %v817_v22 = vadd.f32 %v816_v19, %v803_v18  ;;  %v830_v24 = vpop.f32.mrf.mxu3 }
  0xbb   : > { %v831_v26 = vadd.f32 %v830_v24, %v817_v22 }
  0xc9   : > { %v842_v20 = vpop.f32.mrf.mxu0 }
  0xca   : > { %v843_v23 = vadd.f32 %v842_v20, %v829_v21 }
  0xcc   : > { %1290 = vtanh.f32 %v843_v23 }
  0xd1   : > { %v844_v27 = vpop.f32.mrf.mxu0 }
  0xd2   : > { %v845_v29 = vadd.f32 %v844_v27, %v831_v26  ;;  %v1291_v31 = vpop.eup %1290 }
  0xd3   : > { %v863_v32 = vsel %vm853_vm4, %v1291_v31, 0.0 }
  0xd4   : > { %1292 = vtanh.f32 %v845_v29  ;;  %v872_v36 = vmul.f32 %v863_v32, %v863_v32 }
  0xda   : > { %v1293_v33 = vpop.eup %1292 }
  0xdb   : > { %v1261_v34 = vpack.c.bf16 %v1293_v33, %v1291_v31  ;;  %v864_v35 = vsel %vm856_vm5, %v1293_v33, 0.0 }
  0xdc   : > { %v865_v37 = vadd.f32 %v864_v35, %v863_v32  ;;  %v873_v38 = vmul.f32 %v864_v35, %v864_v35 }
  0xdd   : > { %1262 = vst [vmem:[%s344_s9] sm:$0xff] %v1261_v34  }
  0xde   : > { %v866_v39 = vrot.slane %v865_v37, 4  ;;  %v874_v40 = vadd.f32 %v873_v38, %v872_v36 }
  0xe0   : > { %v867_v41 = vadd.f32 %v866_v39, %v865_v37  ;;  %v875_v42 = vrot.slane %v874_v40, 4 }
  0xe2   : > { %v868_v43 = vrot.slane %v867_v41, 2  ;;  %v876_v44 = vadd.f32 %v875_v42, %v874_v40 }
  0xe4   : > { %v869_v45 = vadd.f32 %v868_v43, %v867_v41  ;;  %v877_v46 = vrot.slane %v876_v44, 2 }
  0xe6   : > { %v870_v47 = vrot.slane %v869_v45, 1  ;;  %v878_v48 = vadd.f32 %v877_v46, %v876_v44 }
  0xe8   : > { %v879_v49 = vrot.slane %v878_v48, 1  ;;  %v871_v50 = vadd.f32 %v870_v47, %v869_v45 }
  0xea   : > { %v880_v51 = vadd.f32 %v879_v49, %v878_v48 }
  0xec   : > { %v882_v52 = vsel %vm881_vm6, %v871_v50, %v880_v51 }
  0xed   : > { %883 = vst [vmem:[%s352_s12] sm:$0x3] %v882_v52 }
  0xee PF: > { %s17_s1 = sadd.s32 1, %s1316_s1   ;;  %s1544_s21 = smov %s1312_s22 }
  0xef   : > { %p14_p5 = scmp.ge.s32.totalorder %s17_s1, 4   ;;  %s1545_s22 = smov %s1547_s23 }
  0xf1   :  { %16 = sbr.rel (!%p14_p5) target bundleno = 2 (0x2), region = 85 }

// kernel: decoder_postnet.5
= control target key start
LH: loop header
LB: loop body
LE: loop exit
PB: predicated region body
PF: predicated region fallthrough
CT: control target
= control target key end

     0   :  { %s1355_s21 = smov 0   ;;  %s1357_s22 = smov 0   ;;  %s1542_s0 = inlined_call_operand.vmem [shape: bf16[2,32,128], index: 0, kind: input, shape index: {}, may-alias: {0,1}]   ;;  %s1543_s1 = inlined_call_operand.vmem [shape: bf16[2,32,128], index: 1, kind: input, shape index: {}, may-alias: {0,1}]   ;;  %s1544_s2 = inlined_call_operand.vmem [shape: f32[1,128], index: 2, kind: input, shape index: {}]   ;;  %s1545_s3 = inlined_call_operand.vmem [shape: bf16[640,128], index: 3, kind: input, shape index: {}]   ;;  %s1546_s4 = inlined_call_operand.vmem [shape: f32[1,128], index: 4, kind: input, shape index: {}]   ;;  %s1547_s5 = inlined_call_operand.vmem [shape: bf16[2,32,128], index: 5, kind: output, shape index: {0}]   ;;  %s1548_s6 = inlined_call_operand.vmem [shape: f32[2,1,2,128], index: 6, kind: output, shape index: {1}]  }
   0x1   :  { %s1359_s23 = smov 0  }
   0x2 LB: > { %s26_s24 = sadd.s32 1, %s1313_s22  ;;  %p1034_p0 = scmp.ge.s32.totalorder %s1317_s23, 1  ;;  %s1317_s23 = sphi %s1359_s23, %s17_s23   ;;  %s1313_s22 = sphi %s1357_s22, %s1550_s22   ;;  %s1309_s21 = sphi %s1355_s21, %s1549_s21  }
   0x3   : > { %p27_p1 = scmp.ge.s32.totalorder %s26_s24, 2  ;;  %p259_p2 = scmp.lt.s32.totalorder %s1317_s23, 3 }
   0x5   : > { %s1552_s24 = smov (%p27_p1, %s26_s24), 0  ;;  %p260_p3 = pnand %p1034_p0, %p259_p2 }
   0x6   : > { %p315_p4 = scmp.lt.s32.totalorder (!%p260_p3), %s1309_s21, 1 }
   0x7   : > { %263 = sbr.rel (%p260_p3) target bundleno = 235 (0xeb), region = 40 }
   0xc   : > { %v1225_v0 = vld [vmem:[%s1545_s3 + $0x38] sm:$0xff]  ;;  %v1224_v4 = vld [vmem:[%s1545_s3 + $0x30] sm:$0xff]  ;;  %s1554_s21 = smov (!%p315_p4, %s1309_s21), 1  ;;  %v380_v6 = vlaneseq  ;;  %v1223_v9 = vld [vmem:[%s1545_s3 + $0x28] sm:$0xff]  ;;  %v1319_v37 = vmov 0.0|0.0   ;;  %vm432_vm2 = vcmask 1046528  }
   0xd   : > { %v1241_v1 = vld [vmem:[%s1545_s3 + $0xb8] sm:$0xff]  ;;  %777 = vmatpush.bf16.msra.mxu0 %v1225_v0  ;;  %v1240_v5 = vld [vmem:[%s1545_s3 + $0xb0] sm:$0xff]  ;;  %s1400_s17 = sshll.u32 %s1554_s21, 4  ;;  %v1239_v10 = vld [vmem:[%s1545_s3 + $0xa8] sm:$0xff]  ;;  %v411_v38 = vunpack.c.l.b16 %v1319_v37  ;;  %vm437_vm3 = vsmask.f32 6400 }
   0xe   : > { %v1249_v2 = vld [vmem:[%s1545_s3 + $0xf8] sm:$0xff]  ;;  %805 = vmatpush.bf16.msra.mxu2 %v1241_v1  ;;  %v1248_v7 = vld [vmem:[%s1545_s3 + $0xf0] sm:$0xff]  ;;  %s1214_s18 = sadd.s32 8, %s1400_s17  ;;  %v381_v11 = vshrl.u32 %v380_v6, 7  ;;  %v1247_v12 = vld [vmem:[%s1545_s3 + $0xe8] sm:$0xff]  ;;  %s322_s9 = scalar_lea.vmem %s1542_s0, %s1400_s17  ;;  %vm448_vm5 = vcmask 1045504  }
   0xf   : > { %v1233_v3 = vld [vmem:[%s1545_s3 + $0x78] sm:$0xff]  ;;  %819 = vmatpush.bf16.msra.mxu3 %v1249_v2  ;;  %v1232_v8 = vld [vmem:[%s1545_s3 + $0x70] sm:$0xff]  ;;  %v1231_v13 = vld [vmem:[%s1545_s3 + $0x68] sm:$0xff]  ;;  %s333_s12 = scalar_lea.vmem %s1543_s1, %s1214_s18  ;;  %vm418_vm4 = vsmask.f32 7424  ;;  %s344_s20 = scalar_lea.vmem %s1547_s5, %s1400_s17  ;;  %vm881_vm6 = vcmask 1040384  }
  0x10   : > { %791 = vmatpush.bf16.msra.mxu1 %v1233_v3  ;;  %v1222_v14 = vld [vmem:[%s1545_s3 + $0x20] sm:$0xff]  ;;  %v382_v18 = vadd.s32 8, %v381_v11  ;;  %v383_v19 = vadd.s32 16, %v381_v11  ;;  %v1221_v25 = vld [vmem:[%s1545_s3 + $0x18] sm:$0xff]  ;;  %v1220_v33 = vld [vmem:[%s1545_s3 + $0x10] sm:$0xff]  ;;  %s1041_s25 = sshll.u32 %s1554_s21, 1 }
  0x11   : > { %778 = vmatpush.bf16.msra.mxu0 %v1224_v4  ;;  %v1238_v15 = vld [vmem:[%s1545_s3 + $0xa0] sm:$0xff]  ;;  %v1237_v26 = vld [vmem:[%s1545_s3 + $0x98] sm:$0xff]  ;;  %v1236_v34 = vld [vmem:[%s1545_s3 + $0x90] sm:$0xff]  ;;  %s352_s27 = scalar_lea.vmem %s1548_s6, %s1041_s25 }
  0x12   : > { %806 = vmatpush.bf16.msra.mxu2 %v1240_v5  ;;  %v1246_v16 = vld [vmem:[%s1545_s3 + $0xe0] sm:$0xff]  ;;  %vm389_vm0 = vcmp.ge.s32.totalorder %v382_v18, 10  ;;  %vm393_vm1 = vcmp.lt.s32.totalorder %v383_v19, 18  ;;  %v1245_v27 = vld [vmem:[%s1545_s3 + $0xd8] sm:$0xff]  ;;  %v1244_v39 = vld [vmem:[%s1545_s3 + $0xd0] sm:$0xff] }
  0x13   : > { %820 = vmatpush.bf16.msra.mxu3 %v1248_v7  ;;  %v1230_v17 = vld [vmem:[%s1545_s3 + $0x60] sm:$0xff]  ;;  %v1229_v28 = vld [vmem:[%s1545_s3 + $0x58] sm:$0xff]  ;;  %v1228_v40 = vld [vmem:[%s1545_s3 + $0x50] sm:$0xff] }
  0x14   : > { %792 = vmatpush.bf16.msra.mxu1 %v1232_v8  ;;  %v1216_v20 = vld [vmem:[%s322_s9] sm:$0xff]  ;;  %v1219_v43 = vld [vmem:[%s1545_s3 + $0x8] sm:$0xff]  ;;  %v1257_v60 = vld [vmem:[%s1545_s3 + $0x138] sm:$0xff] }
  0x15   : > { %779 = vmatpush.bf16.msra.mxu0 %v1223_v9  ;;  %v1217_v21 = vld [vmem:[%s333_s12] sm:$0xf]  ;;  %v371_v23 = vunpack.c.h.bf16 %v1216_v20  ;;  %v1235_v44 = vld [vmem:[%s1545_s3 + $0x88] sm:$0xff]  ;;  %v1256_v6 = vld [vmem:[%s1545_s3 + $0x130] sm:$0xff] }
  0x16   : > { %807 = vmatpush.bf16.msra.mxu2 %v1239_v10  ;;  %v1289_v22 = vld [vmem:[%s1544_s2] ss:$0 sm:$0xff]  ;;  %v372_v24 = vunpack.c.l.bf16 %v1217_v21  ;;  %v1243_v47 = vld [vmem:[%s1545_s3 + $0xc8] sm:$0xff]  ;;  %v1253_v11 = vld [vmem:[%s1545_s3 + $0x118] sm:$0xff] }
  0x17   : > { %821 = vmatpush.bf16.msra.mxu3 %v1247_v12  ;;  %v378_v29 = vadd.f32 %v1289_v22, %v371_v23  ;;  %v1227_v48 = vld [vmem:[%s1545_s3 + $0x48] sm:$0xff]  ;;  %v1218_v54 = vld [vmem:[%s1545_s3] sm:$0xff]  ;;  %v1252_v12 = vld [vmem:[%s1545_s3 + $0x110] sm:$0xff] }
  0x18   : > { %793 = vmatpush.bf16.msra.mxu1 %v1231_v13  ;;  %v379_v30 = vadd.f32 %v1289_v22, %v372_v24  ;;  %v1234_v55 = vld [vmem:[%s1545_s3 + $0x80] sm:$0xff]  ;;  %v1255_v9 = vld [vmem:[%s1545_s3 + $0x128] sm:$0xff] }
  0x19   : > { %780 = vmatpush.bf16.msra.mxu0 %v1222_v14  ;;  %v404_v31 = vsel %vm389_vm0, %v378_v29, 0.0  ;;  %v1242_v61 = vld [vmem:[%s1545_s3 + $0xc0] sm:$0xff]  ;;  %v1251_v13 = vld [vmem:[%s1545_s3 + $0x108] sm:$0xff] }
  0x1a   : > { %808 = vmatpush.bf16.msra.mxu2 %v1238_v15  ;;  %v405_v32 = vsel %vm393_vm1, %v379_v30, 0.0  ;;  %v407_v35 = vpack.c.bf16 %v404_v31, %v404_v31  ;;  %v1226_v0 = vld [vmem:[%s1545_s3 + $0x40] sm:$0xff] }
  0x1b   : > { %822 = vmatpush.bf16.msra.mxu3 %v1246_v16  ;;  %v408_v36 = vpack.c.bf16 %v405_v32, %v405_v32  ;;  %v1254_v10 = vld [vmem:[%s1545_s3 + $0x120] sm:$0xff] }
  0x1c   : > { %794 = vmatpush.bf16.msra.mxu1 %v1230_v17  ;;  %v412_v41 = vunpack.c.l.b16 %v407_v35  ;;  %v1250_v14 = vld [vmem:[%s1545_s3 + $0x100] sm:$0xff] }
  0x1d   : > { %781 = vmatpush.bf16.msra.mxu0 %v1221_v25  ;;  %v416_v42 = vunpack.c.l.b16 %v408_v36  ;;  %v1290_v20 = vld [vmem:[%s1546_s4] ss:$0 sm:$0xff] }
  0x1e   : > { %809 = vmatpush.bf16.msra.mxu2 %v1237_v26  ;;  %v1467_v45 = vpack.c.b16 %v412_v41, %v411_v38 }
  0x1f   : > { %823 = vmatpush.bf16.msra.mxu3 %v1245_v27  ;;  %v1469_v46 = vpack.c.b16 %v416_v42, %v416_v42 }
  0x20   : > { %795 = vmatpush.bf16.msra.mxu1 %v1229_v28  ;;  %v420_v49 = vshrl.u32 %v1467_v45, 16  ;;  %v422_v50 = vshll.u32 %v1467_v45, 16  ;;  %v433_v51 = vrot.slane %v1467_v45, 1  ;;  %v449_v15 = vrot.slane %v1467_v45, 2 }
  0x21   : > { %782 = vmatpush.bf16.msra.mxu0 %v1220_v33  ;;  %v427_v52 = vshll.u32 %v1469_v46, 16  ;;  %v441_v53 = vshrl.u32 %v1469_v46, 16  ;;  %v434_v56 = vrot.slane %v1469_v46, 1  ;;  %v450_v16 = vrot.slane %v1469_v46, 2 }
  0x22   : > { %810 = vmatpush.bf16.msra.mxu2 %v1236_v34  ;;  %v438_v57 = vrot.slane %v420_v49, 1  ;;  %v439_v58 = vrot.slane %v422_v50, 2  ;;  %v424_v59 = vrot.slane %v422_v50, 1 }
  0x23   : > { %824 = vmatpush.bf16.msra.mxu3 %v1244_v39  ;;  %v443_v62 = vrot.slane %v441_v53, 1  ;;  %v444_v63 = vrot.slane %v427_v52, 2  ;;  %v429_v3 = vrot.slane %v427_v52, 1  ;;  %v435_v5 = vsel %vm432_vm2, %v433_v51, %v434_v56 }
  0x24   : > { %796 = vmatpush.bf16.msra.mxu1 %v1228_v40  ;;  %v440_v1 = vor.u32 %v439_v58, %v438_v57  ;;  %v425_v2 = vor.u32 %v424_v59, %v420_v49  ;;  %v451_v17 = vsel %vm448_vm5, %v449_v15, %v450_v16 }
  0x25   : > { %783 = vmatpush.bf16.msra.mxu0 %v1219_v43  ;;  %v445_v4 = vor.u32 %v444_v63, %v443_v62 }
  0x26   : > { %811 = vmatpush.bf16.msra.mxu2 %v1235_v44  ;;  %v430_v8 = vsel %vm418_vm4, %v425_v2, %v429_v3 }
  0x27   : > { %825 = vmatpush.bf16.msra.mxu3 %v1243_v47  ;;  %v446_v7 = vsel %vm437_vm3, %v440_v1, %v445_v4 }
  0x28   : > { %797 = vmatpush.bf16.msra.mxu1 %v1227_v48 }
  0x29   : > { %784 = vmatpush.bf16.msra.mxu0 %v1218_v54 }
  0x2a   : > { %812 = vmatpush.bf16.msra.mxu2 %v1234_v55 }
  0x2b   : > { %826 = vmatpush.bf16.msra.mxu3 %v1242_v61 }
  0x2c   : > { %798 = vmatpush.bf16.msra.mxu1 %v1226_v0  ;;  %785 = vmatmul.bf16.vlgmr.msra.gmra.mxu0 %v1467_v45 }
  0x2d   : > { %833 = vmatpush.bf16.msrb.mxu0 %v1257_v60  ;;  %813 = vmatmul.bf16.vlgmr.msra.gmra.mxu2 %v435_v5 }
  0x2e   : > { %827 = vmatmul.bf16.vlgmr.msra.gmra.mxu3 %v446_v7 }
  0x2f   : > { %799 = vmatmul.bf16.vlgmr.msra.gmra.mxu1 %v430_v8 }
  0x31   : > { %834 = vmatpush.bf16.msrb.mxu0 %v1256_v6 }
  0x35   : > { %835 = vmatpush.bf16.msrb.mxu0 %v1255_v9 }
  0x39   : > { %836 = vmatpush.bf16.msrb.mxu0 %v1254_v10 }
  0x3d   : > { %837 = vmatpush.bf16.msrb.mxu0 %v1253_v11 }
  0x41   : > { %838 = vmatpush.bf16.msrb.mxu0 %v1252_v12 }
  0x45   : > { %839 = vmatpush.bf16.msrb.mxu0 %v1251_v13 }
  0x49   : > { %840 = vmatpush.bf16.msrb.mxu0 %v1250_v14 }
  0x4c   : > { %841 = vmatmul.bf16.vlgmr.msrb.gmra.mxu0 %v451_v17 }
  0xa9   : > { %v786_v18 = vpop.f32.mrf.mxu0 }
  0xaa   : > { %v787_v22 = vadd.f32 %v1290_v20, %v786_v18 }
  0xac   : > { %v800_v19 = vpop.f32.mrf.mxu1 }
  0xad   : > { %v801_v26 = vadd.f32 %v800_v19, %v787_v22 }
  0xb0   : > { %v814_v21 = vpop.f32.mrf.mxu2 }
  0xb1   : > { %v788_v23 = vpop.f32.mrf.mxu0  ;;  %v828_v24 = vpop.f32.mrf.mxu3  ;;  %v815_v29 = vadd.f32 %v814_v21, %v801_v26 }
  0xb2   : > { %v789_v25 = vadd.f32 %v1290_v20, %v788_v23 }
  0xb3   : > { %v829_v33 = vadd.f32 %v828_v24, %v815_v29 }
  0xb4   : > { %v802_v27 = vpop.f32.mrf.mxu1 }
  0xb5   : > { %v803_v28 = vadd.f32 %v802_v27, %v789_v25 }
  0xb8   : > { %v816_v30 = vpop.f32.mrf.mxu2 }
  0xb9   : > { %v817_v32 = vadd.f32 %v816_v30, %v803_v28  ;;  %v830_v34 = vpop.f32.mrf.mxu3 }
  0xbb   : > { %v831_v36 = vadd.f32 %v830_v34, %v817_v32 }
  0xc9   : > { %v842_v31 = vpop.f32.mrf.mxu0 }
  0xca   : > { %v843_v35 = vadd.f32 %v842_v31, %v829_v33 }
  0xcc   : > { %1291 = vtanh.f32 %v843_v35 }
  0xd1   : > { %v844_v37 = vpop.f32.mrf.mxu0 }
  0xd2   : > { %v845_v38 = vadd.f32 %v844_v37, %v831_v36  ;;  %v1292_v39 = vpop.eup %1291 }
  0xd4   : > { %1293 = vtanh.f32 %v845_v38 }
  0xda   : > { %v1294_v40 = vpop.eup %1293 }
  0xdb   : > { %v1261_v41 = vpack.c.bf16 %v1294_v40, %v1292_v39  ;;  %v866_v42 = vrot.slane %v1294_v40, 4  ;;  %v873_v43 = vmul.f32 %v1294_v40, %v1294_v40 }
  0xdd   : > { %1262 = vst [vmem:[%s344_s20] sm:$0xff] %v1261_v41   ;;  %v867_v44 = vadd.f32 %v1294_v40, %v866_v42  ;;  %v875_v45 = vrot.slane %v873_v43, 4 }
  0xdf   : > { %v868_v46 = vrot.slane %v867_v44, 2  ;;  %v876_v47 = vadd.f32 %v875_v45, %v873_v43 }
  0xe1   : > { %v869_v48 = vadd.f32 %v868_v46, %v867_v44  ;;  %v877_v49 = vrot.slane %v876_v47, 2 }
  0xe3   : > { %v870_v50 = vrot.slane %v869_v48, 1  ;;  %v878_v51 = vadd.f32 %v877_v49, %v876_v47 }
  0xe5   : > { %v879_v52 = vrot.slane %v878_v51, 1  ;;  %v871_v53 = vadd.f32 %v870_v50, %v869_v48 }
  0xe7   : > { %v880_v54 = vadd.f32 %v879_v52, %v878_v51 }
  0xe9   : > { %v882_v55 = vsel %vm881_vm6, %v871_v53, %v880_v54 }
  0xea   : > { %883 = vst [vmem:[%s352_s27] sm:$0x3] %v882_v55 }
  0xeb PF: > { %s17_s23 = sadd.s32 1, %s1317_s23   ;;  %s1549_s21 = smov %s1313_s22 }
  0xec   : > { %p14_p5 = scmp.ge.s32.totalorder %s17_s23, 4   ;;  %s1550_s22 = smov %s1552_s24 }
  0xee   :  { %16 = sbr.rel (!%p14_p5) target bundleno = 2 (0x2), region = 85 }

// kernel: decoder_postnet.7
= control target key start
LH: loop header
LB: loop body
LE: loop exit
PB: predicated region body
PF: predicated region fallthrough
CT: control target
= control target key end

     0   :  { %s1354_s21 = smov 0   ;;  %s1356_s22 = smov 0   ;;  %s1539_s0 = inlined_call_operand.vmem [shape: bf16[2,32,128], index: 0, kind: input, shape index: {}, may-alias: {0,1}]   ;;  %s1540_s1 = inlined_call_operand.vmem [shape: bf16[2,32,128], index: 1, kind: input, shape index: {}, may-alias: {0,1}]   ;;  %s1541_s2 = inlined_call_operand.vmem [shape: f32[1,128], index: 2, kind: input, shape index: {}]   ;;  %s1542_s3 = inlined_call_operand.vmem [shape: bf16[640,128], index: 3, kind: input, shape index: {}]   ;;  %s1543_s4 = inlined_call_operand.vmem [shape: f32[1,128], index: 4, kind: input, shape index: {}]   ;;  %s1544_s5 = inlined_call_operand.vmem [shape: bf16[2,32,128], index: 5, kind: output, shape index: {0}]   ;;  %s1545_s6 = inlined_call_operand.vmem [shape: f32[2,1,2,128], index: 6, kind: output, shape index: {1}]  }
   0x1   :  { %s1358_s1 = smov 0  }
   0x2 LB: > { %s26_s23 = sadd.s32 1, %s1312_s22  ;;  %p1034_p0 = scmp.ge.s32.totalorder %s1316_s1, 1  ;;  %s1316_s1 = sphi %s1358_s1, %s17_s1   ;;  %s1312_s22 = sphi %s1356_s22, %s1547_s22   ;;  %s1308_s21 = sphi %s1354_s21, %s1546_s21  }
   0x3   : > { %p27_p1 = scmp.ge.s32.totalorder %s26_s23, 2  ;;  %p259_p2 = scmp.lt.s32.totalorder %s1316_s1, 3 }
   0x5   : > { %s1549_s23 = smov (%p27_p1, %s26_s23), 0  ;;  %p260_p3 = pnand %p1034_p0, %p259_p2 }
   0x6   : > { %p315_p4 = scmp.lt.s32.totalorder (!%p260_p3), %s1308_s21, 1 }
   0x7   : > { %263 = sbr.rel (%p260_p3) target bundleno = 238 (0xee), region = 40 }
   0xc   : > { %v1225_v0 = vld [vmem:[%s1542_s3 + $0x38] sm:$0xff]  ;;  %v1224_v4 = vld [vmem:[%s1542_s3 + $0x30] sm:$0xff]  ;;  %s1551_s21 = smov (!%p315_p4, %s1308_s21), 1  ;;  %v380_v6 = vlaneseq  ;;  %v1223_v9 = vld [vmem:[%s1542_s3 + $0x28] sm:$0xff]  ;;  %v1318_v21 = vmov 0.0|0.0   ;;  %vm432_vm2 = vcmask 1046528  }
   0xd   : > { %v1241_v1 = vld [vmem:[%s1542_s3 + $0xb8] sm:$0xff]  ;;  %777 = vmatpush.bf16.msra.mxu0 %v1225_v0  ;;  %v1240_v5 = vld [vmem:[%s1542_s3 + $0xb0] sm:$0xff]  ;;  %s1212_s16 = sshll.u32 %s1551_s21, 4  ;;  %v1239_v10 = vld [vmem:[%s1542_s3 + $0xa8] sm:$0xff]  ;;  %v416_v22 = vunpack.c.l.b16 %v1318_v21  ;;  %vm437_vm3 = vsmask.f32 6400 }
   0xe   : > { %v1249_v2 = vld [vmem:[%s1542_s3 + $0xf8] sm:$0xff]  ;;  %805 = vmatpush.bf16.msra.mxu2 %v1241_v1  ;;  %v1248_v7 = vld [vmem:[%s1542_s3 + $0xf0] sm:$0xff]  ;;  %v1405_v11 = vshrl.u32 %v380_v6, 7  ;;  %v1247_v12 = vld [vmem:[%s1542_s3 + $0xe8] sm:$0xff]  ;;  %s322_s30 = scalar_lea.vmem %s1539_s0, %s1212_s16  ;;  %vm418_vm4 = vsmask.f32 7424  ;;  %s344_s9 = scalar_lea.vmem %s1544_s5, %s1212_s16 }
   0xf   : > { %v1233_v3 = vld [vmem:[%s1542_s3 + $0x78] sm:$0xff]  ;;  %819 = vmatpush.bf16.msra.mxu3 %v1249_v2  ;;  %v1232_v8 = vld [vmem:[%s1542_s3 + $0x70] sm:$0xff]  ;;  %v1231_v13 = vld [vmem:[%s1542_s3 + $0x68] sm:$0xff]  ;;  %v1450_v31 = vpack.c.b16 %v416_v22, %v416_v22  ;;  %vm448_vm5 = vcmask 1045504   ;;  %s1041_s10 = sshll.u32 %s1551_s21, 1  ;;  %vm881_vm8 = vcmask 1040384  }
  0x10   : > { %791 = vmatpush.bf16.msra.mxu1 %v1233_v3  ;;  %v1222_v14 = vld [vmem:[%s1542_s3 + $0x20] sm:$0xff]  ;;  %v1431_v18 = vadd.s32 8, %v1405_v11  ;;  %v1221_v25 = vld [vmem:[%s1542_s3 + $0x18] sm:$0xff]  ;;  %vm388_vm0 = vcmp.ge.s32.totalorder %v1405_v11, 6  ;;  %v1220_v34 = vld [vmem:[%s1542_s3 + $0x10] sm:$0xff]  ;;  %vm853_vm6 = vcmp.ge.s32.totalorder %v1405_v11, 4  ;;  %s352_s12 = scalar_lea.vmem %s1545_s6, %s1041_s10 }
  0x11   : > { %778 = vmatpush.bf16.msra.mxu0 %v1224_v4  ;;  %v1238_v15 = vld [vmem:[%s1542_s3 + $0xa0] sm:$0xff]  ;;  %v1237_v26 = vld [vmem:[%s1542_s3 + $0x98] sm:$0xff]  ;;  %v1236_v35 = vld [vmem:[%s1542_s3 + $0x90] sm:$0xff]  ;;  %v427_v40 = vshll.u32 %v1450_v31, 16  ;;  %v441_v41 = vshrl.u32 %v1450_v31, 16  ;;  %v434_v53 = vrot.slane %v1450_v31, 1 }
  0x12   : > { %806 = vmatpush.bf16.msra.mxu2 %v1240_v5  ;;  %v1246_v16 = vld [vmem:[%s1542_s3 + $0xe0] sm:$0xff]  ;;  %vm392_vm1 = vcmp.lt.s32.totalorder %v1431_v18, 14  ;;  %v1245_v27 = vld [vmem:[%s1542_s3 + $0xd8] sm:$0xff]  ;;  %v1244_v38 = vld [vmem:[%s1542_s3 + $0xd0] sm:$0xff]  ;;  %vm856_vm7 = vcmp.lt.s32.totalorder %v1431_v18, 12 }
  0x13   : > { %820 = vmatpush.bf16.msra.mxu3 %v1248_v7  ;;  %v1230_v17 = vld [vmem:[%s1542_s3 + $0x60] sm:$0xff]  ;;  %v1229_v28 = vld [vmem:[%s1542_s3 + $0x58] sm:$0xff]  ;;  %v1228_v39 = vld [vmem:[%s1542_s3 + $0x50] sm:$0xff]  ;;  %v443_v49 = vrot.slane %v441_v41, 1  ;;  %v444_v50 = vrot.slane %v427_v40, 2  ;;  %v429_v2 = vrot.slane %v427_v40, 1 }
  0x14   : > { %792 = vmatpush.bf16.msra.mxu1 %v1232_v8  ;;  %v1216_v19 = vld [vmem:[%s322_s30] sm:$0xff]  ;;  %v1219_v44 = vld [vmem:[%s1542_s3 + $0x8] sm:$0xff]  ;;  %v1257_v60 = vld [vmem:[%s1542_s3 + $0x138] sm:$0xff] }
  0x15   : > { %779 = vmatpush.bf16.msra.mxu0 %v1223_v9  ;;  %v1288_v20 = vld [vmem:[%s1541_s2] ss:$0 sm:$0xff]  ;;  %v370_v23 = vunpack.c.l.bf16 %v1216_v19  ;;  %v371_v24 = vunpack.c.h.bf16 %v1216_v19  ;;  %v1235_v45 = vld [vmem:[%s1542_s3 + $0x88] sm:$0xff]  ;;  %v445_v62 = vor.u32 %v444_v50, %v443_v49  ;;  %v1256_v4 = vld [vmem:[%s1542_s3 + $0x130] sm:$0xff] }
  0x16   : > { %807 = vmatpush.bf16.msra.mxu2 %v1239_v10  ;;  %v1243_v47 = vld [vmem:[%s1542_s3 + $0xc8] sm:$0xff]  ;;  %v1218_v54 = vld [vmem:[%s1542_s3] sm:$0xff]  ;;  %v1253_v9 = vld [vmem:[%s1542_s3 + $0x118] sm:$0xff] }
  0x17   : > { %821 = vmatpush.bf16.msra.mxu3 %v1247_v12  ;;  %v377_v29 = vadd.f32 %v1288_v20, %v370_v23  ;;  %v378_v30 = vadd.f32 %v1288_v20, %v371_v24  ;;  %v1227_v48 = vld [vmem:[%s1542_s3 + $0x48] sm:$0xff]  ;;  %v1234_v55 = vld [vmem:[%s1542_s3 + $0x80] sm:$0xff]  ;;  %v1252_v10 = vld [vmem:[%s1542_s3 + $0x110] sm:$0xff] }
  0x18   : > { %793 = vmatpush.bf16.msra.mxu1 %v1231_v13  ;;  %v1242_v61 = vld [vmem:[%s1542_s3 + $0xc0] sm:$0xff]  ;;  %v1255_v7 = vld [vmem:[%s1542_s3 + $0x128] sm:$0xff] }
  0x19   : > { %780 = vmatpush.bf16.msra.mxu0 %v1222_v14  ;;  %v403_v32 = vsel %vm388_vm0, %v377_v29, 0.0  ;;  %v404_v33 = vsel %vm392_vm1, %v378_v30, 0.0  ;;  %v1226_v63 = vld [vmem:[%s1542_s3 + $0x40] sm:$0xff]  ;;  %v1251_v12 = vld [vmem:[%s1542_s3 + $0x108] sm:$0xff] }
  0x1a   : > { %808 = vmatpush.bf16.msra.mxu2 %v1238_v15  ;;  %v406_v36 = vpack.c.bf16 %v403_v32, %v403_v32  ;;  %v407_v37 = vpack.c.bf16 %v404_v33, %v404_v33  ;;  %v1254_v8 = vld [vmem:[%s1542_s3 + $0x120] sm:$0xff]  ;;  %v450_v15 = vrot.slane %v1450_v31, 2 }
  0x1b   : > { %822 = vmatpush.bf16.msra.mxu3 %v1246_v16  ;;  %v1250_v13 = vld [vmem:[%s1542_s3 + $0x100] sm:$0xff] }
  0x1c   : > { %794 = vmatpush.bf16.msra.mxu1 %v1230_v17  ;;  %v411_v42 = vunpack.c.l.b16 %v406_v36  ;;  %v412_v43 = vunpack.c.l.b16 %v407_v37  ;;  %v1289_v19 = vld [vmem:[%s1543_s4] ss:$0 sm:$0xff] }
  0x1d   : > { %781 = vmatpush.bf16.msra.mxu0 %v1221_v25 }
  0x1e   : > { %809 = vmatpush.bf16.msra.mxu2 %v1237_v26  ;;  %v413_v46 = vpack.c.b16 %v412_v43, %v411_v42 }
  0x1f   : > { %823 = vmatpush.bf16.msra.mxu3 %v1245_v27 }
  0x20   : > { %795 = vmatpush.bf16.msra.mxu1 %v1229_v28  ;;  %v420_v51 = vshrl.u32 %v413_v46, 16  ;;  %v422_v52 = vshll.u32 %v413_v46, 16  ;;  %v433_v56 = vrot.slane %v413_v46, 1  ;;  %v449_v14 = vrot.slane %v413_v46, 2 }
  0x21   : > { %782 = vmatpush.bf16.msra.mxu0 %v1220_v34 }
  0x22   : > { %810 = vmatpush.bf16.msra.mxu2 %v1236_v35  ;;  %v438_v57 = vrot.slane %v420_v51, 1  ;;  %v439_v58 = vrot.slane %v422_v52, 2  ;;  %v424_v59 = vrot.slane %v422_v52, 1  ;;  %v435_v3 = vsel %vm432_vm2, %v433_v56, %v434_v53 }
  0x23   : > { %824 = vmatpush.bf16.msra.mxu3 %v1244_v38  ;;  %v451_v16 = vsel %vm448_vm5, %v449_v14, %v450_v15 }
  0x24   : > { %796 = vmatpush.bf16.msra.mxu1 %v1228_v39  ;;  %v440_v0 = vor.u32 %v439_v58, %v438_v57  ;;  %v425_v1 = vor.u32 %v424_v59, %v420_v51 }
  0x25   : > { %783 = vmatpush.bf16.msra.mxu0 %v1219_v44 }
  0x26   : > { %811 = vmatpush.bf16.msra.mxu2 %v1235_v45  ;;  %v446_v5 = vsel %vm437_vm3, %v440_v0, %v445_v62  ;;  %v430_v6 = vsel %vm418_vm4, %v425_v1, %v429_v2 }
  0x27   : > { %825 = vmatpush.bf16.msra.mxu3 %v1243_v47 }
  0x28   : > { %797 = vmatpush.bf16.msra.mxu1 %v1227_v48 }
  0x29   : > { %784 = vmatpush.bf16.msra.mxu0 %v1218_v54 }
  0x2a   : > { %812 = vmatpush.bf16.msra.mxu2 %v1234_v55 }
  0x2b   : > { %826 = vmatpush.bf16.msra.mxu3 %v1242_v61 }
  0x2c   : > { %798 = vmatpush.bf16.msra.mxu1 %v1226_v63  ;;  %785 = vmatmul.bf16.vlgmr.msra.gmra.mxu0 %v413_v46 }
  0x2d   : > { %833 = vmatpush.bf16.msrb.mxu0 %v1257_v60  ;;  %813 = vmatmul.bf16.vlgmr.msra.gmra.mxu2 %v435_v3 }
  0x2e   : > { %827 = vmatmul.bf16.vlgmr.msra.gmra.mxu3 %v446_v5 }
  0x2f   : > { %799 = vmatmul.bf16.vlgmr.msra.gmra.mxu1 %v430_v6 }
  0x31   : > { %834 = vmatpush.bf16.msrb.mxu0 %v1256_v4 }
  0x35   : > { %835 = vmatpush.bf16.msrb.mxu0 %v1255_v7 }
  0x39   : > { %836 = vmatpush.bf16.msrb.mxu0 %v1254_v8 }
  0x3d   : > { %837 = vmatpush.bf16.msrb.mxu0 %v1253_v9 }
  0x41   : > { %838 = vmatpush.bf16.msrb.mxu0 %v1252_v10 }
  0x45   : > { %839 = vmatpush.bf16.msrb.mxu0 %v1251_v12 }
  0x49   : > { %840 = vmatpush.bf16.msrb.mxu0 %v1250_v13 }
  0x4c   : > { %841 = vmatmul.bf16.vlgmr.msrb.gmra.mxu0 %v451_v16 }
  0xa9   : > { %v786_v17 = vpop.f32.mrf.mxu0 }
  0xaa   : > { %v787_v21 = vadd.f32 %v1289_v19, %v786_v17 }
  0xac   : > { %v800_v20 = vpop.f32.mrf.mxu1 }
  0xad   : > { %v801_v24 = vadd.f32 %v800_v20, %v787_v21 }
  0xb0   : > { %v814_v22 = vpop.f32.mrf.mxu2 }
  0xb1   : > { %v788_v23 = vpop.f32.mrf.mxu0  ;;  %v828_v25 = vpop.f32.mrf.mxu3  ;;  %v815_v28 = vadd.f32 %v814_v22, %v801_v24 }
  0xb2   : > { %v789_v26 = vadd.f32 %v1289_v19, %v788_v23 }
  0xb3   : > { %v829_v32 = vadd.f32 %v828_v25, %v815_v28 }
  0xb4   : > { %v802_v27 = vpop.f32.mrf.mxu1 }
  0xb5   : > { %v803_v29 = vadd.f32 %v802_v27, %v789_v26 }
  0xb8   : > { %v816_v30 = vpop.f32.mrf.mxu2 }
  0xb9   : > { %v817_v33 = vadd.f32 %v816_v30, %v803_v29  ;;  %v830_v35 = vpop.f32.mrf.mxu3 }
  0xbb   : > { %v831_v36 = vadd.f32 %v830_v35, %v817_v33 }
  0xc9   : > { %v842_v31 = vpop.f32.mrf.mxu0 }
  0xca   : > { %v843_v34 = vadd.f32 %v842_v31, %v829_v32 }
  0xcc   : > { %1290 = vtanh.f32 %v843_v34 }
  0xd1   : > { %v844_v37 = vpop.f32.mrf.mxu0 }
  0xd2   : > { %v845_v38 = vadd.f32 %v844_v37, %v831_v36  ;;  %v1291_v39 = vpop.eup %1290 }
  0xd3   : > { %v863_v40 = vsel %vm853_vm6, %v1291_v39, 0.0 }
  0xd4   : > { %1292 = vtanh.f32 %v845_v38  ;;  %v872_v44 = vmul.f32 %v863_v40, %v863_v40 }
  0xda   : > { %v1293_v41 = vpop.eup %1292 }
  0xdb   : > { %v1261_v42 = vpack.c.bf16 %v1293_v41, %v1291_v39  ;;  %v864_v43 = vsel %vm856_vm7, %v1293_v41, 0.0 }
  0xdc   : > { %v865_v45 = vadd.f32 %v864_v43, %v863_v40  ;;  %v873_v46 = vmul.f32 %v864_v43, %v864_v43 }
  0xdd   : > { %1262 = vst [vmem:[%s344_s9] sm:$0xff] %v1261_v42  }
  0xde   : > { %v866_v47 = vrot.slane %v865_v45, 4  ;;  %v874_v48 = vadd.f32 %v873_v46, %v872_v44 }
  0xe0   : > { %v867_v49 = vadd.f32 %v866_v47, %v865_v45  ;;  %v875_v11 = vrot.slane %v874_v48, 4 }
  0xe2   : > { %v868_v50 = vrot.slane %v867_v49, 2  ;;  %v876_v18 = vadd.f32 %v875_v11, %v874_v48 }
  0xe4   : > { %v869_v51 = vadd.f32 %v868_v50, %v867_v49  ;;  %v877_v52 = vrot.slane %v876_v18, 2 }
  0xe6   : > { %v870_v53 = vrot.slane %v869_v51, 1  ;;  %v878_v54 = vadd.f32 %v877_v52, %v876_v18 }
  0xe8   : > { %v879_v55 = vrot.slane %v878_v54, 1  ;;  %v871_v56 = vadd.f32 %v870_v53, %v869_v51 }
  0xea   : > { %v880_v57 = vadd.f32 %v879_v55, %v878_v54 }
  0xec   : > { %v882_v58 = vsel %vm881_vm8, %v871_v56, %v880_v57 }
  0xed   : > { %883 = vst [vmem:[%s352_s12] sm:$0x3] %v882_v58 }
  0xee PF: > { %s17_s1 = sadd.s32 1, %s1316_s1   ;;  %s1546_s21 = smov %s1312_s22 }
  0xef   : > { %p14_p5 = scmp.ge.s32.totalorder %s17_s1, 4   ;;  %s1547_s22 = smov %s1549_s23 }
  0xf1   :  { %16 = sbr.rel (!%p14_p5) target bundleno = 2 (0x2), region = 85 }

// kernel: decoder_postnet.8
= control target key start
LH: loop header
LB: loop body
LE: loop exit
PB: predicated region body
PF: predicated region fallthrough
CT: control target
= control target key end

     0   :  { %s1354_s21 = smov 0   ;;  %s1356_s22 = smov 0   ;;  %s1539_s0 = inlined_call_operand.vmem [shape: bf16[2,32,128], index: 0, kind: input, shape index: {}, may-alias: {0,1}]   ;;  %s1540_s1 = inlined_call_operand.vmem [shape: bf16[2,32,128], index: 1, kind: input, shape index: {}, may-alias: {0,1}]   ;;  %s1541_s2 = inlined_call_operand.vmem [shape: f32[1,128], index: 2, kind: input, shape index: {}]   ;;  %s1542_s3 = inlined_call_operand.vmem [shape: bf16[640,128], index: 3, kind: input, shape index: {}]   ;;  %s1543_s4 = inlined_call_operand.vmem [shape: f32[1,128], index: 4, kind: input, shape index: {}]   ;;  %s1544_s5 = inlined_call_operand.vmem [shape: bf16[2,32,128], index: 5, kind: output, shape index: {0}]   ;;  %s1545_s6 = inlined_call_operand.vmem [shape: f32[2,1,2,128], index: 6, kind: output, shape index: {1}]  }
   0x1   :  { %s1358_s1 = smov 0  }
   0x2 LB: > { %s26_s23 = sadd.s32 1, %s1312_s22  ;;  %p1034_p0 = scmp.ge.s32.totalorder %s1316_s1, 1  ;;  %s1316_s1 = sphi %s1358_s1, %s17_s1   ;;  %s1312_s22 = sphi %s1356_s22, %s1547_s22   ;;  %s1308_s21 = sphi %s1354_s21, %s1546_s21  }
   0x3   : > { %p27_p1 = scmp.ge.s32.totalorder %s26_s23, 2  ;;  %p259_p2 = scmp.lt.s32.totalorder %s1316_s1, 3 }
   0x5   : > { %s1549_s23 = smov (%p27_p1, %s26_s23), 0  ;;  %p260_p3 = pnand %p1034_p0, %p259_p2 }
   0x6   : > { %p315_p4 = scmp.lt.s32.totalorder (!%p260_p3), %s1308_s21, 1 }
   0x7   : > { %263 = sbr.rel (%p260_p3) target bundleno = 238 (0xee), region = 40 }
   0xc   : > { %v1225_v0 = vld [vmem:[%s1542_s3 + $0x38] sm:$0xff]  ;;  %v1224_v4 = vld [vmem:[%s1542_s3 + $0x30] sm:$0xff]  ;;  %s1551_s21 = smov (!%p315_p4, %s1308_s21), 1  ;;  %v380_v6 = vlaneseq  ;;  %v1223_v9 = vld [vmem:[%s1542_s3 + $0x28] sm:$0xff]  ;;  %v1318_v21 = vmov 0.0|0.0   ;;  %vm432_vm2 = vcmask 1046528  }
   0xd   : > { %v1241_v1 = vld [vmem:[%s1542_s3 + $0xb8] sm:$0xff]  ;;  %777 = vmatpush.bf16.msra.mxu0 %v1225_v0  ;;  %v1240_v5 = vld [vmem:[%s1542_s3 + $0xb0] sm:$0xff]  ;;  %s1212_s16 = sshll.u32 %s1551_s21, 4  ;;  %v1239_v10 = vld [vmem:[%s1542_s3 + $0xa8] sm:$0xff]  ;;  %v416_v22 = vunpack.c.l.b16 %v1318_v21  ;;  %vm437_vm3 = vsmask.f32 6400 }
   0xe   : > { %v1249_v2 = vld [vmem:[%s1542_s3 + $0xf8] sm:$0xff]  ;;  %805 = vmatpush.bf16.msra.mxu2 %v1241_v1  ;;  %v1248_v7 = vld [vmem:[%s1542_s3 + $0xf0] sm:$0xff]  ;;  %v1405_v11 = vshrl.u32 %v380_v6, 7  ;;  %v1247_v12 = vld [vmem:[%s1542_s3 + $0xe8] sm:$0xff]  ;;  %s322_s30 = scalar_lea.vmem %s1539_s0, %s1212_s16  ;;  %vm418_vm4 = vsmask.f32 7424  ;;  %s344_s9 = scalar_lea.vmem %s1544_s5, %s1212_s16 }
   0xf   : > { %v1233_v3 = vld [vmem:[%s1542_s3 + $0x78] sm:$0xff]  ;;  %819 = vmatpush.bf16.msra.mxu3 %v1249_v2  ;;  %v1232_v8 = vld [vmem:[%s1542_s3 + $0x70] sm:$0xff]  ;;  %v1231_v13 = vld [vmem:[%s1542_s3 + $0x68] sm:$0xff]  ;;  %v1450_v31 = vpack.c.b16 %v416_v22, %v416_v22  ;;  %vm448_vm5 = vcmask 1045504   ;;  %s1041_s10 = sshll.u32 %s1551_s21, 1  ;;  %vm881_vm8 = vcmask 1040384  }
  0x10   : > { %791 = vmatpush.bf16.msra.mxu1 %v1233_v3  ;;  %v1222_v14 = vld [vmem:[%s1542_s3 + $0x20] sm:$0xff]  ;;  %v1431_v18 = vadd.s32 8, %v1405_v11  ;;  %v1221_v25 = vld [vmem:[%s1542_s3 + $0x18] sm:$0xff]  ;;  %vm388_vm0 = vcmp.ge.s32.totalorder %v1405_v11, 4  ;;  %v1220_v34 = vld [vmem:[%s1542_s3 + $0x10] sm:$0xff]  ;;  %vm853_vm6 = vcmp.ge.s32.totalorder %v1405_v11, 2  ;;  %s352_s12 = scalar_lea.vmem %s1545_s6, %s1041_s10 }
  0x11   : > { %778 = vmatpush.bf16.msra.mxu0 %v1224_v4  ;;  %v1238_v15 = vld [vmem:[%s1542_s3 + $0xa0] sm:$0xff]  ;;  %v1237_v26 = vld [vmem:[%s1542_s3 + $0x98] sm:$0xff]  ;;  %v1236_v35 = vld [vmem:[%s1542_s3 + $0x90] sm:$0xff]  ;;  %v427_v40 = vshll.u32 %v1450_v31, 16  ;;  %v441_v41 = vshrl.u32 %v1450_v31, 16  ;;  %v434_v53 = vrot.slane %v1450_v31, 1 }
  0x12   : > { %806 = vmatpush.bf16.msra.mxu2 %v1240_v5  ;;  %v1246_v16 = vld [vmem:[%s1542_s3 + $0xe0] sm:$0xff]  ;;  %vm392_vm1 = vcmp.lt.s32.totalorder %v1431_v18, 12  ;;  %v1245_v27 = vld [vmem:[%s1542_s3 + $0xd8] sm:$0xff]  ;;  %v1244_v38 = vld [vmem:[%s1542_s3 + $0xd0] sm:$0xff]  ;;  %vm856_vm7 = vcmp.lt.s32.totalorder %v1431_v18, 10 }
  0x13   : > { %820 = vmatpush.bf16.msra.mxu3 %v1248_v7  ;;  %v1230_v17 = vld [vmem:[%s1542_s3 + $0x60] sm:$0xff]  ;;  %v1229_v28 = vld [vmem:[%s1542_s3 + $0x58] sm:$0xff]  ;;  %v1228_v39 = vld [vmem:[%s1542_s3 + $0x50] sm:$0xff]  ;;  %v443_v49 = vrot.slane %v441_v41, 1  ;;  %v444_v50 = vrot.slane %v427_v40, 2  ;;  %v429_v2 = vrot.slane %v427_v40, 1 }
  0x14   : > { %792 = vmatpush.bf16.msra.mxu1 %v1232_v8  ;;  %v1216_v19 = vld [vmem:[%s322_s30] sm:$0xff]  ;;  %v1219_v44 = vld [vmem:[%s1542_s3 + $0x8] sm:$0xff]  ;;  %v1257_v60 = vld [vmem:[%s1542_s3 + $0x138] sm:$0xff] }
  0x15   : > { %779 = vmatpush.bf16.msra.mxu0 %v1223_v9  ;;  %v1288_v20 = vld [vmem:[%s1541_s2] ss:$0 sm:$0xff]  ;;  %v370_v23 = vunpack.c.l.bf16 %v1216_v19  ;;  %v371_v24 = vunpack.c.h.bf16 %v1216_v19  ;;  %v1235_v45 = vld [vmem:[%s1542_s3 + $0x88] sm:$0xff]  ;;  %v445_v62 = vor.u32 %v444_v50, %v443_v49  ;;  %v1256_v4 = vld [vmem:[%s1542_s3 + $0x130] sm:$0xff] }
  0x16   : > { %807 = vmatpush.bf16.msra.mxu2 %v1239_v10  ;;  %v1243_v47 = vld [vmem:[%s1542_s3 + $0xc8] sm:$0xff]  ;;  %v1218_v54 = vld [vmem:[%s1542_s3] sm:$0xff]  ;;  %v1253_v9 = vld [vmem:[%s1542_s3 + $0x118] sm:$0xff] }
  0x17   : > { %821 = vmatpush.bf16.msra.mxu3 %v1247_v12  ;;  %v377_v29 = vadd.f32 %v1288_v20, %v370_v23  ;;  %v378_v30 = vadd.f32 %v1288_v20, %v371_v24  ;;  %v1227_v48 = vld [vmem:[%s1542_s3 + $0x48] sm:$0xff]  ;;  %v1234_v55 = vld [vmem:[%s1542_s3 + $0x80] sm:$0xff]  ;;  %v1252_v10 = vld [vmem:[%s1542_s3 + $0x110] sm:$0xff] }
  0x18   : > { %793 = vmatpush.bf16.msra.mxu1 %v1231_v13  ;;  %v1242_v61 = vld [vmem:[%s1542_s3 + $0xc0] sm:$0xff]  ;;  %v1255_v7 = vld [vmem:[%s1542_s3 + $0x128] sm:$0xff] }
  0x19   : > { %780 = vmatpush.bf16.msra.mxu0 %v1222_v14  ;;  %v403_v32 = vsel %vm388_vm0, %v377_v29, 0.0  ;;  %v404_v33 = vsel %vm392_vm1, %v378_v30, 0.0  ;;  %v1226_v63 = vld [vmem:[%s1542_s3 + $0x40] sm:$0xff]  ;;  %v1251_v12 = vld [vmem:[%s1542_s3 + $0x108] sm:$0xff] }
  0x1a   : > { %808 = vmatpush.bf16.msra.mxu2 %v1238_v15  ;;  %v406_v36 = vpack.c.bf16 %v403_v32, %v403_v32  ;;  %v407_v37 = vpack.c.bf16 %v404_v33, %v404_v33  ;;  %v1254_v8 = vld [vmem:[%s1542_s3 + $0x120] sm:$0xff]  ;;  %v450_v15 = vrot.slane %v1450_v31, 2 }
  0x1b   : > { %822 = vmatpush.bf16.msra.mxu3 %v1246_v16  ;;  %v1250_v13 = vld [vmem:[%s1542_s3 + $0x100] sm:$0xff] }
  0x1c   : > { %794 = vmatpush.bf16.msra.mxu1 %v1230_v17  ;;  %v411_v42 = vunpack.c.l.b16 %v406_v36  ;;  %v412_v43 = vunpack.c.l.b16 %v407_v37  ;;  %v1289_v19 = vld [vmem:[%s1543_s4] ss:$0 sm:$0xff] }
  0x1d   : > { %781 = vmatpush.bf16.msra.mxu0 %v1221_v25 }
  0x1e   : > { %809 = vmatpush.bf16.msra.mxu2 %v1237_v26  ;;  %v413_v46 = vpack.c.b16 %v412_v43, %v411_v42 }
  0x1f   : > { %823 = vmatpush.bf16.msra.mxu3 %v1245_v27 }
  0x20   : > { %795 = vmatpush.bf16.msra.mxu1 %v1229_v28  ;;  %v420_v51 = vshrl.u32 %v413_v46, 16  ;;  %v422_v52 = vshll.u32 %v413_v46, 16  ;;  %v433_v56 = vrot.slane %v413_v46, 1  ;;  %v449_v14 = vrot.slane %v413_v46, 2 }
  0x21   : > { %782 = vmatpush.bf16.msra.mxu0 %v1220_v34 }
  0x22   : > { %810 = vmatpush.bf16.msra.mxu2 %v1236_v35  ;;  %v438_v57 = vrot.slane %v420_v51, 1  ;;  %v439_v58 = vrot.slane %v422_v52, 2  ;;  %v424_v59 = vrot.slane %v422_v52, 1  ;;  %v435_v3 = vsel %vm432_vm2, %v433_v56, %v434_v53 }
  0x23   : > { %824 = vmatpush.bf16.msra.mxu3 %v1244_v38  ;;  %v451_v16 = vsel %vm448_vm5, %v449_v14, %v450_v15 }
  0x24   : > { %796 = vmatpush.bf16.msra.mxu1 %v1228_v39  ;;  %v440_v0 = vor.u32 %v439_v58, %v438_v57  ;;  %v425_v1 = vor.u32 %v424_v59, %v420_v51 }
  0x25   : > { %783 = vmatpush.bf16.msra.mxu0 %v1219_v44 }
  0x26   : > { %811 = vmatpush.bf16.msra.mxu2 %v1235_v45  ;;  %v446_v5 = vsel %vm437_vm3, %v440_v0, %v445_v62  ;;  %v430_v6 = vsel %vm418_vm4, %v425_v1, %v429_v2 }
  0x27   : > { %825 = vmatpush.bf16.msra.mxu3 %v1243_v47 }
  0x28   : > { %797 = vmatpush.bf16.msra.mxu1 %v1227_v48 }
  0x29   : > { %784 = vmatpush.bf16.msra.mxu0 %v1218_v54 }
  0x2a   : > { %812 = vmatpush.bf16.msra.mxu2 %v1234_v55 }
  0x2b   : > { %826 = vmatpush.bf16.msra.mxu3 %v1242_v61 }
  0x2c   : > { %798 = vmatpush.bf16.msra.mxu1 %v1226_v63  ;;  %785 = vmatmul.bf16.vlgmr.msra.gmra.mxu0 %v413_v46 }
  0x2d   : > { %833 = vmatpush.bf16.msrb.mxu0 %v1257_v60  ;;  %813 = vmatmul.bf16.vlgmr.msra.gmra.mxu2 %v435_v3 }
  0x2e   : > { %827 = vmatmul.bf16.vlgmr.msra.gmra.mxu3 %v446_v5 }
  0x2f   : > { %799 = vmatmul.bf16.vlgmr.msra.gmra.mxu1 %v430_v6 }
  0x31   : > { %834 = vmatpush.bf16.msrb.mxu0 %v1256_v4 }
  0x35   : > { %835 = vmatpush.bf16.msrb.mxu0 %v1255_v7 }
  0x39   : > { %836 = vmatpush.bf16.msrb.mxu0 %v1254_v8 }
  0x3d   : > { %837 = vmatpush.bf16.msrb.mxu0 %v1253_v9 }
  0x41   : > { %838 = vmatpush.bf16.msrb.mxu0 %v1252_v10 }
  0x45   : > { %839 = vmatpush.bf16.msrb.mxu0 %v1251_v12 }
  0x49   : > { %840 = vmatpush.bf16.msrb.mxu0 %v1250_v13 }
  0x4c   : > { %841 = vmatmul.bf16.vlgmr.msrb.gmra.mxu0 %v451_v16 }
  0xa9   : > { %v786_v17 = vpop.f32.mrf.mxu0 }
  0xaa   : > { %v787_v21 = vadd.f32 %v1289_v19, %v786_v17 }
  0xac   : > { %v800_v20 = vpop.f32.mrf.mxu1 }
  0xad   : > { %v801_v24 = vadd.f32 %v800_v20, %v787_v21 }
  0xb0   : > { %v814_v22 = vpop.f32.mrf.mxu2 }
  0xb1   : > { %v788_v23 = vpop.f32.mrf.mxu0  ;;  %v828_v25 = vpop.f32.mrf.mxu3  ;;  %v815_v28 = vadd.f32 %v814_v22, %v801_v24 }
  0xb2   : > { %v789_v26 = vadd.f32 %v1289_v19, %v788_v23 }
  0xb3   : > { %v829_v32 = vadd.f32 %v828_v25, %v815_v28 }
  0xb4   : > { %v802_v27 = vpop.f32.mrf.mxu1 }
  0xb5   : > { %v803_v29 = vadd.f32 %v802_v27, %v789_v26 }
  0xb8   : > { %v816_v30 = vpop.f32.mrf.mxu2 }
  0xb9   : > { %v817_v33 = vadd.f32 %v816_v30, %v803_v29  ;;  %v830_v35 = vpop.f32.mrf.mxu3 }
  0xbb   : > { %v831_v36 = vadd.f32 %v830_v35, %v817_v33 }
  0xc9   : > { %v842_v31 = vpop.f32.mrf.mxu0 }
  0xca   : > { %v843_v34 = vadd.f32 %v842_v31, %v829_v32 }
  0xcc   : > { %1290 = vtanh.f32 %v843_v34 }
  0xd1   : > { %v844_v37 = vpop.f32.mrf.mxu0 }
  0xd2   : > { %v845_v38 = vadd.f32 %v844_v37, %v831_v36  ;;  %v1291_v39 = vpop.eup %1290 }
  0xd3   : > { %v863_v40 = vsel %vm853_vm6, %v1291_v39, 0.0 }
  0xd4   : > { %1292 = vtanh.f32 %v845_v38  ;;  %v872_v44 = vmul.f32 %v863_v40, %v863_v40 }
  0xda   : > { %v1293_v41 = vpop.eup %1292 }
  0xdb   : > { %v1261_v42 = vpack.c.bf16 %v1293_v41, %v1291_v39  ;;  %v864_v43 = vsel %vm856_vm7, %v1293_v41, 0.0 }
  0xdc   : > { %v865_v45 = vadd.f32 %v864_v43, %v863_v40  ;;  %v873_v46 = vmul.f32 %v864_v43, %v864_v43 }
  0xdd   : > { %1262 = vst [vmem:[%s344_s9] sm:$0xff] %v1261_v42  }
  0xde   : > { %v866_v47 = vrot.slane %v865_v45, 4  ;;  %v874_v48 = vadd.f32 %v873_v46, %v872_v44 }
  0xe0   : > { %v867_v49 = vadd.f32 %v866_v47, %v865_v45  ;;  %v875_v11 = vrot.slane %v874_v48, 4 }
  0xe2   : > { %v868_v50 = vrot.slane %v867_v49, 2  ;;  %v876_v18 = vadd.f32 %v875_v11, %v874_v48 }
  0xe4   : > { %v869_v51 = vadd.f32 %v868_v50, %v867_v49  ;;  %v877_v52 = vrot.slane %v876_v18, 2 }
  0xe6   : > { %v870_v53 = vrot.slane %v869_v51, 1  ;;  %v878_v54 = vadd.f32 %v877_v52, %v876_v18 }
  0xe8   : > { %v879_v55 = vrot.slane %v878_v54, 1  ;;  %v871_v56 = vadd.f32 %v870_v53, %v869_v51 }
  0xea   : > { %v880_v57 = vadd.f32 %v879_v55, %v878_v54 }
  0xec   : > { %v882_v58 = vsel %vm881_vm8, %v871_v56, %v880_v57 }
  0xed   : > { %883 = vst [vmem:[%s352_s12] sm:$0x3] %v882_v58 }
  0xee PF: > { %s17_s1 = sadd.s32 1, %s1316_s1   ;;  %s1546_s21 = smov %s1312_s22 }
  0xef   : > { %p14_p5 = scmp.ge.s32.totalorder %s17_s1, 4   ;;  %s1547_s22 = smov %s1549_s23 }
  0xf1   :  { %16 = sbr.rel (!%p14_p5) target bundleno = 2 (0x2), region = 85 }

// kernel: decoder_postnet.9
= control target key start
LH: loop header
LB: loop body
LE: loop exit
PB: predicated region body
PF: predicated region fallthrough
CT: control target
= control target key end

     0   :  { %s1217_s18 = smov 0   ;;  %s1219_s19 = smov 0   ;;  %s1386_s0 = inlined_call_operand.vmem [shape: bf16[2,32,128], index: 0, kind: input, shape index: {}, may-alias: {0,1}]   ;;  %s1387_s1 = inlined_call_operand.vmem [shape: bf16[2,32,128], index: 1, kind: input, shape index: {}, may-alias: {0,1}]   ;;  %s1388_s2 = inlined_call_operand.vmem [shape: f32[1,128], index: 2, kind: input, shape index: {}]   ;;  %s1389_s3 = inlined_call_operand.vmem [shape: bf16[640,128], index: 3, kind: input, shape index: {}]   ;;  %s1390_s4 = inlined_call_operand.vmem [shape: f32[1,128], index: 4, kind: input, shape index: {}]   ;;  %s1391_s5 = inlined_call_operand.vmem [shape: f32[2,32,128], index: 5, kind: output, shape index: {}]  }
   0x1   :  { %s1221_s20 = smov 0  }
   0x2 LB: > { %s24_s1 = sadd.s32 1, %s1180_s19  ;;  %p912_p0 = scmp.ge.s32.totalorder %s1184_s20, 1  ;;  %s1184_s20 = sphi %s1221_s20, %s15_s20   ;;  %s1180_s19 = sphi %s1219_s19, %s1393_s19   ;;  %s1176_s18 = sphi %s1217_s18, %s1392_s18  }
   0x3   : > { %p25_p1 = scmp.ge.s32.totalorder %s24_s1, 2  ;;  %p229_p2 = scmp.lt.s32.totalorder %s1184_s20, 3 }
   0x5   : > { %s1395_s1 = smov (%p25_p1, %s24_s1), 0  ;;  %p230_p3 = pnand %p912_p0, %p229_p2 }
   0x6   : > { %p276_p4 = scmp.lt.s32.totalorder (!%p230_p3), %s1176_s18, 1 }
   0x7   : > { %233 = sbr.rel (%p230_p3) target bundleno = 213 (0xd5), region = 40 }
   0xc   : > { %v1102_v0 = vld [vmem:[%s1389_s3 + $0x38] sm:$0xff]  ;;  %v1101_v4 = vld [vmem:[%s1389_s3 + $0x30] sm:$0xff]  ;;  %s1397_s18 = smov (!%p276_p4, %s1176_s18), 1  ;;  %v334_v6 = vlaneseq  ;;  %v1100_v9 = vld [vmem:[%s1389_s3 + $0x28] sm:$0xff]  ;;  %v1186_v21 = vmov 0.0|0.0   ;;  %vm386_vm2 = vcmask 1046528  }
   0xd   : > { %v1118_v1 = vld [vmem:[%s1389_s3 + $0xb8] sm:$0xff]  ;;  %731 = vmatpush.bf16.msra.mxu0 %v1102_v0  ;;  %v1117_v5 = vld [vmem:[%s1389_s3 + $0xb0] sm:$0xff]  ;;  %s1089_s12 = sshll.u32 %s1397_s18, 4  ;;  %v1116_v10 = vld [vmem:[%s1389_s3 + $0xa8] sm:$0xff]  ;;  %v370_v22 = vunpack.c.l.b16 %v1186_v21  ;;  %vm391_vm3 = vsmask.f32 6400 }
   0xe   : > { %v1126_v2 = vld [vmem:[%s1389_s3 + $0xf8] sm:$0xff]  ;;  %759 = vmatpush.bf16.msra.mxu2 %v1118_v1  ;;  %v1125_v7 = vld [vmem:[%s1389_s3 + $0xf0] sm:$0xff]  ;;  %v335_v11 = vshrl.u32 %v334_v6, 7  ;;  %v1124_v12 = vld [vmem:[%s1389_s3 + $0xe8] sm:$0xff]  ;;  %s283_s26 = scalar_lea.vmem %s1386_s0, %s1089_s12  ;;  %vm372_vm4 = vsmask.f32 7424 }
   0xf   : > { %v1110_v3 = vld [vmem:[%s1389_s3 + $0x78] sm:$0xff]  ;;  %773 = vmatpush.bf16.msra.mxu3 %v1126_v2  ;;  %v1109_v8 = vld [vmem:[%s1389_s3 + $0x70] sm:$0xff]  ;;  %v1108_v13 = vld [vmem:[%s1389_s3 + $0x68] sm:$0xff]  ;;  %v1304_v31 = vpack.c.b16 %v370_v22, %v370_v22  ;;  %vm402_vm5 = vcmask 1045504   ;;  %s1092_s21 = sshll.u32 %s1397_s18, 5 }
  0x10   : > { %745 = vmatpush.bf16.msra.mxu1 %v1110_v3  ;;  %v1099_v14 = vld [vmem:[%s1389_s3 + $0x20] sm:$0xff]  ;;  %v336_v18 = vadd.s32 8, %v335_v11  ;;  %v1098_v25 = vld [vmem:[%s1389_s3 + $0x18] sm:$0xff]  ;;  %vm342_vm0 = vcmp.ge.s32.totalorder %v335_v11, 2  ;;  %v1097_v34 = vld [vmem:[%s1389_s3 + $0x10] sm:$0xff]  ;;  %s305_s24 = scalar_lea.vmem %s1391_s5, %s1092_s21 }
  0x11   : > { %732 = vmatpush.bf16.msra.mxu0 %v1101_v4  ;;  %v1115_v15 = vld [vmem:[%s1389_s3 + $0xa0] sm:$0xff]  ;;  %v1114_v26 = vld [vmem:[%s1389_s3 + $0x98] sm:$0xff]  ;;  %v1113_v35 = vld [vmem:[%s1389_s3 + $0x90] sm:$0xff]  ;;  %v381_v40 = vshll.u32 %v1304_v31, 16  ;;  %v395_v41 = vshrl.u32 %v1304_v31, 16  ;;  %v388_v53 = vrot.slane %v1304_v31, 1 }
  0x12   : > { %760 = vmatpush.bf16.msra.mxu2 %v1117_v5  ;;  %v1123_v16 = vld [vmem:[%s1389_s3 + $0xe0] sm:$0xff]  ;;  %vm346_vm1 = vcmp.lt.s32.totalorder %v336_v18, 10  ;;  %v1122_v27 = vld [vmem:[%s1389_s3 + $0xd8] sm:$0xff]  ;;  %v1121_v38 = vld [vmem:[%s1389_s3 + $0xd0] sm:$0xff] }
  0x13   : > { %774 = vmatpush.bf16.msra.mxu3 %v1125_v7  ;;  %v1107_v17 = vld [vmem:[%s1389_s3 + $0x60] sm:$0xff]  ;;  %v1106_v28 = vld [vmem:[%s1389_s3 + $0x58] sm:$0xff]  ;;  %v1105_v39 = vld [vmem:[%s1389_s3 + $0x50] sm:$0xff]  ;;  %v397_v49 = vrot.slane %v395_v41, 1  ;;  %v398_v50 = vrot.slane %v381_v40, 2  ;;  %v383_v2 = vrot.slane %v381_v40, 1 }
  0x14   : > { %746 = vmatpush.bf16.msra.mxu1 %v1109_v8  ;;  %v1093_v19 = vld [vmem:[%s283_s26] sm:$0xff]  ;;  %v1096_v44 = vld [vmem:[%s1389_s3 + $0x8] sm:$0xff]  ;;  %v1134_v60 = vld [vmem:[%s1389_s3 + $0x138] sm:$0xff] }
  0x15   : > { %733 = vmatpush.bf16.msra.mxu0 %v1100_v9  ;;  %v1160_v20 = vld [vmem:[%s1388_s2] ss:$0 sm:$0xff]  ;;  %v324_v23 = vunpack.c.l.bf16 %v1093_v19  ;;  %v325_v24 = vunpack.c.h.bf16 %v1093_v19  ;;  %v1112_v45 = vld [vmem:[%s1389_s3 + $0x88] sm:$0xff]  ;;  %v399_v62 = vor.u32 %v398_v50, %v397_v49  ;;  %v1133_v4 = vld [vmem:[%s1389_s3 + $0x130] sm:$0xff] }
  0x16   : > { %761 = vmatpush.bf16.msra.mxu2 %v1116_v10  ;;  %v1120_v47 = vld [vmem:[%s1389_s3 + $0xc8] sm:$0xff]  ;;  %v1095_v54 = vld [vmem:[%s1389_s3] sm:$0xff]  ;;  %v1130_v9 = vld [vmem:[%s1389_s3 + $0x118] sm:$0xff] }
  0x17   : > { %775 = vmatpush.bf16.msra.mxu3 %v1124_v12  ;;  %v331_v29 = vadd.f32 %v1160_v20, %v324_v23  ;;  %v332_v30 = vadd.f32 %v1160_v20, %v325_v24  ;;  %v1104_v48 = vld [vmem:[%s1389_s3 + $0x48] sm:$0xff]  ;;  %v1111_v55 = vld [vmem:[%s1389_s3 + $0x80] sm:$0xff]  ;;  %v1129_v10 = vld [vmem:[%s1389_s3 + $0x110] sm:$0xff] }
  0x18   : > { %747 = vmatpush.bf16.msra.mxu1 %v1108_v13  ;;  %v1119_v61 = vld [vmem:[%s1389_s3 + $0xc0] sm:$0xff]  ;;  %v1132_v7 = vld [vmem:[%s1389_s3 + $0x128] sm:$0xff] }
  0x19   : > { %734 = vmatpush.bf16.msra.mxu0 %v1099_v14  ;;  %v357_v32 = vsel %vm342_vm0, %v331_v29, 0.0  ;;  %v358_v33 = vsel %vm346_vm1, %v332_v30, 0.0  ;;  %v1103_v63 = vld [vmem:[%s1389_s3 + $0x40] sm:$0xff]  ;;  %v1128_v11 = vld [vmem:[%s1389_s3 + $0x108] sm:$0xff]  ;;  %v404_v14 = vrot.slane %v1304_v31, 2 }
  0x1a   : > { %762 = vmatpush.bf16.msra.mxu2 %v1115_v15  ;;  %v360_v36 = vpack.c.bf16 %v357_v32, %v357_v32  ;;  %v361_v37 = vpack.c.bf16 %v358_v33, %v358_v33  ;;  %v1131_v8 = vld [vmem:[%s1389_s3 + $0x120] sm:$0xff] }
  0x1b   : > { %776 = vmatpush.bf16.msra.mxu3 %v1123_v16  ;;  %v1127_v12 = vld [vmem:[%s1389_s3 + $0x100] sm:$0xff] }
  0x1c   : > { %748 = vmatpush.bf16.msra.mxu1 %v1107_v17  ;;  %v365_v42 = vunpack.c.l.b16 %v360_v36  ;;  %v366_v43 = vunpack.c.l.b16 %v361_v37  ;;  %v1161_v17 = vld [vmem:[%s1390_s4] ss:$0 sm:$0xff] }
  0x1d   : > { %735 = vmatpush.bf16.msra.mxu0 %v1098_v25 }
  0x1e   : > { %763 = vmatpush.bf16.msra.mxu2 %v1114_v26  ;;  %v367_v46 = vpack.c.b16 %v366_v43, %v365_v42 }
  0x1f   : > { %777 = vmatpush.bf16.msra.mxu3 %v1122_v27 }
  0x20   : > { %749 = vmatpush.bf16.msra.mxu1 %v1106_v28  ;;  %v374_v51 = vshrl.u32 %v367_v46, 16  ;;  %v376_v52 = vshll.u32 %v367_v46, 16  ;;  %v387_v56 = vrot.slane %v367_v46, 1  ;;  %v403_v13 = vrot.slane %v367_v46, 2 }
  0x21   : > { %736 = vmatpush.bf16.msra.mxu0 %v1097_v34 }
  0x22   : > { %764 = vmatpush.bf16.msra.mxu2 %v1113_v35  ;;  %v392_v57 = vrot.slane %v374_v51, 1  ;;  %v393_v58 = vrot.slane %v376_v52, 2  ;;  %v378_v59 = vrot.slane %v376_v52, 1  ;;  %v389_v3 = vsel %vm386_vm2, %v387_v56, %v388_v53 }
  0x23   : > { %778 = vmatpush.bf16.msra.mxu3 %v1121_v38  ;;  %v405_v15 = vsel %vm402_vm5, %v403_v13, %v404_v14 }
  0x24   : > { %750 = vmatpush.bf16.msra.mxu1 %v1105_v39  ;;  %v394_v0 = vor.u32 %v393_v58, %v392_v57  ;;  %v379_v1 = vor.u32 %v378_v59, %v374_v51 }
  0x25   : > { %737 = vmatpush.bf16.msra.mxu0 %v1096_v44 }
  0x26   : > { %765 = vmatpush.bf16.msra.mxu2 %v1112_v45  ;;  %v400_v5 = vsel %vm391_vm3, %v394_v0, %v399_v62  ;;  %v384_v6 = vsel %vm372_vm4, %v379_v1, %v383_v2 }
  0x27   : > { %779 = vmatpush.bf16.msra.mxu3 %v1120_v47 }
  0x28   : > { %751 = vmatpush.bf16.msra.mxu1 %v1104_v48 }
  0x29   : > { %738 = vmatpush.bf16.msra.mxu0 %v1095_v54 }
  0x2a   : > { %766 = vmatpush.bf16.msra.mxu2 %v1111_v55 }
  0x2b   : > { %780 = vmatpush.bf16.msra.mxu3 %v1119_v61 }
  0x2c   : > { %752 = vmatpush.bf16.msra.mxu1 %v1103_v63  ;;  %739 = vmatmul.bf16.vlgmr.msra.gmra.mxu0 %v367_v46 }
  0x2d   : > { %787 = vmatpush.bf16.msrb.mxu0 %v1134_v60  ;;  %767 = vmatmul.bf16.vlgmr.msra.gmra.mxu2 %v389_v3 }
  0x2e   : > { %781 = vmatmul.bf16.vlgmr.msra.gmra.mxu3 %v400_v5 }
  0x2f   : > { %753 = vmatmul.bf16.vlgmr.msra.gmra.mxu1 %v384_v6 }
  0x31   : > { %788 = vmatpush.bf16.msrb.mxu0 %v1133_v4 }
  0x35   : > { %789 = vmatpush.bf16.msrb.mxu0 %v1132_v7 }
  0x39   : > { %790 = vmatpush.bf16.msrb.mxu0 %v1131_v8 }
  0x3d   : > { %791 = vmatpush.bf16.msrb.mxu0 %v1130_v9 }
  0x41   : > { %792 = vmatpush.bf16.msrb.mxu0 %v1129_v10 }
  0x45   : > { %793 = vmatpush.bf16.msrb.mxu0 %v1128_v11 }
  0x49   : > { %794 = vmatpush.bf16.msrb.mxu0 %v1127_v12 }
  0x4c   : > { %795 = vmatmul.bf16.vlgmr.msrb.gmra.mxu0 %v405_v15 }
  0xa9   : > { %v740_v16 = vpop.f32.mrf.mxu0 }
  0xaa   : > { %v741_v19 = vadd.f32 %v1161_v17, %v740_v16 }
  0xac   : > { %v754_v18 = vpop.f32.mrf.mxu1 }
  0xad   : > { %v755_v21 = vadd.f32 %v754_v18, %v741_v19 }
  0xb0   : > { %v768_v20 = vpop.f32.mrf.mxu2 }
  0xb1   : > { %v742_v22 = vpop.f32.mrf.mxu0  ;;  %v782_v23 = vpop.f32.mrf.mxu3  ;;  %v769_v24 = vadd.f32 %v768_v20, %v755_v21 }
  0xb2   : > { %v743_v25 = vadd.f32 %v1161_v17, %v742_v22 }
  0xb3   : > { %v783_v27 = vadd.f32 %v782_v23, %v769_v24 }
  0xb4   : > { %v756_v26 = vpop.f32.mrf.mxu1 }
  0xb5   : > { %v757_v28 = vadd.f32 %v756_v26, %v743_v25 }
  0xb8   : > { %v770_v29 = vpop.f32.mrf.mxu2 }
  0xb9   : > { %v771_v32 = vadd.f32 %v770_v29, %v757_v28  ;;  %v784_v33 = vpop.f32.mrf.mxu3 }
  0xbb   : > { %v785_v34 = vadd.f32 %v784_v33, %v771_v32 }
  0xc9   : > { %v796_v30 = vpop.f32.mrf.mxu0 }
  0xca   : > { %v797_v31 = vadd.f32 %v796_v30, %v783_v27 }
  0xcc   : > { %801 = vst [vmem:[%s305_s24] sm:$0xff] %v797_v31 }
  0xd1   : > { %v798_v35 = vpop.f32.mrf.mxu0 }
  0xd2   : > { %v799_v36 = vadd.f32 %v798_v35, %v785_v34 }
  0xd4   : > { %802 = vst [vmem:[%s305_s24 + $0x8] sm:$0xff] %v799_v36 }
  0xd5 PF: > { %s15_s20 = sadd.s32 1, %s1184_s20   ;;  %s1392_s18 = smov %s1180_s19 }
  0xd6   : > { %p12_p5 = scmp.ge.s32.totalorder %s15_s20, 4   ;;  %s1393_s19 = smov %s1395_s1 }
  0xd8   :  { %14 = sbr.rel (!%p12_p5) target bundleno = 2 (0x2), region = 73 }

</bundles_post_ra>
